<compile_context>
chip_gen: v6e
topology: v6e:2x2x1
jax: 0.10.0
libtpu: 0.0.40
codegen_flags: <defaults>
</compile_context>

<pallas_src>
import functools

import jax
import jax.numpy as jnp
from jax.experimental import pallas as pl
from jax.experimental.pallas import tpu as pltpu


def _drqn_kernel(x_ref, h0_ref, c0_ref,
                 wih_ref, whh_ref, b_ref,
                 w1_ref, b1_ref, w2_ref, b2_ref,
                 out_ref, hT_ref, cT_ref,
                 xg_i, xg_f, xg_g, xg_o, hs,
                 *, T, Bp, H, unroll):
    # ---- prologue: batched input projection for all timesteps (one matmul) ----
    xproj = (jnp.dot(x_ref[...], wih_ref[...], preferred_element_type=jnp.float32)
             + b_ref[...])                                   # (T*Bp, 4H)
    # split per gate ONCE (PyTorch gate order: i, f, g, o)
    xg_i[...] = xproj[:, 0 * H:1 * H]
    xg_f[...] = xproj[:, 1 * H:2 * H]
    xg_g[...] = xproj[:, 2 * H:3 * H]
    xg_o[...] = xproj[:, 3 * H:4 * H]

    # per-gate recurrent weights, sliced once (loop-invariant values)
    w_hh = whh_ref[...]                                      # (H, 4H)
    wh_i = w_hh[:, 0 * H:1 * H]
    wh_f = w_hh[:, 1 * H:2 * H]
    wh_g = w_hh[:, 2 * H:3 * H]
    wh_o = w_hh[:, 3 * H:4 * H]

    def step(t, carry):
        h, c = carry
        row = pl.multiple_of(t * Bp, Bp)                     # sublane-aligned offset
        pre_i = xg_i[pl.ds(row, Bp), :] + jnp.dot(h, wh_i, preferred_element_type=jnp.float32)
        pre_f = xg_f[pl.ds(row, Bp), :] + jnp.dot(h, wh_f, preferred_element_type=jnp.float32)
        pre_g = xg_g[pl.ds(row, Bp), :] + jnp.dot(h, wh_g, preferred_element_type=jnp.float32)
        pre_o = xg_o[pl.ds(row, Bp), :] + jnp.dot(h, wh_o, preferred_element_type=jnp.float32)

        i_g = jax.nn.sigmoid(pre_i)
        f_g = jax.nn.sigmoid(pre_f)
        g_g = jnp.tanh(pre_g)
        o_g = jax.nn.sigmoid(pre_o)

        c_new = f_g * c + i_g * g_g
        h_new = o_g * jnp.tanh(c_new)

        hs[pl.ds(row, Bp), :] = h_new                        # collect for batched MLP
        return h_new, c_new

    h0 = h0_ref[...].astype(jnp.float32)
    c0 = c0_ref[...].astype(jnp.float32)
    hT, cT = jax.lax.fori_loop(0, T, step, (h0, c0), unroll=unroll)

    hT_ref[...] = hT.astype(hT_ref.dtype)
    cT_ref[...] = cT.astype(cT_ref.dtype)

    # ---- MLP head, batched over all (T*Bp) rows, single output store ----
    h_all = hs[...]                                          # (T*Bp, H)
    hid = jnp.maximum(
        jnp.dot(h_all, w1_ref[...], preferred_element_type=jnp.float32) + b1_ref[...],
        0.0)
    y = jnp.dot(hid, w2_ref[...], preferred_element_type=jnp.float32) + b2_ref[...]
    out_ref[...] = y.astype(out_ref.dtype)


def drqn_forward(x, hidden_state, params):
    """x: (B, T, inp_dim) float32;  hidden_state: (h0, c0) each (1, B, H).

    Returns (output, (h_T, c_T)) matching the PyTorch module:
      output: (B, T, tr_count), h_T/c_T: (1, B, H).
    """
    h0, c0 = hidden_state
    B, T, I = x.shape
    H = h0.shape[-1]
    Hd = params["w1_t"].shape[-1]
    TR = params["w2_t"].shape[-1]

    SUB = 8                                      # f32 sublane count
    Bp = ((B + SUB - 1) // SUB) * SUB            # pad batch to sublane multiple

    x_tm = jnp.transpose(x, (1, 0, 2))           # (T, B, I) time-major
    h0_2d = h0.reshape(B, H)
    c0_2d = c0.reshape(B, H)
    if Bp != B:
        x_tm = jnp.pad(x_tm, ((0, 0), (0, Bp - B), (0, 0)))
        h0_2d = jnp.pad(h0_2d, ((0, Bp - B), (0, 0)))
        c0_2d = jnp.pad(c0_2d, ((0, Bp - B), (0, 0)))
    x_flat = x_tm.reshape(T * Bp, I)

    b_comb = (params["b_ih"] + params["b_hh"]).reshape(1, 4 * H)
    b1 = params["b1"].reshape(1, Hd)
    b2 = params["b2"].reshape(1, TR)

    full2 = lambda i: (0, 0)
    kernel = functools.partial(_drqn_kernel, T=T, Bp=Bp, H=H, unroll=(T <= 16))

    out_flat, hT, cT = pl.pallas_call(
        kernel,
        out_shape=(
            jax.ShapeDtypeStruct((T * Bp, TR), jnp.float32),
            jax.ShapeDtypeStruct((Bp, H), jnp.float32),
            jax.ShapeDtypeStruct((Bp, H), jnp.float32),
        ),
        grid_spec=pltpu.PrefetchScalarGridSpec(
            num_scalar_prefetch=0,
            grid=(1,),
            in_specs=[
                pl.BlockSpec((T * Bp, I), full2),      # x (time-major, flat)
                pl.BlockSpec((Bp, H), full2),          # h0
                pl.BlockSpec((Bp, H), full2),          # c0
                pl.BlockSpec((I, 4 * H), full2),       # W_ih^T
                pl.BlockSpec((H, 4 * H), full2),       # W_hh^T
                pl.BlockSpec((1, 4 * H), full2),       # b_ih + b_hh
                pl.BlockSpec((H, Hd), full2),          # W1^T
                pl.BlockSpec((1, Hd), full2),          # b1
                pl.BlockSpec((Hd, TR), full2),         # W2^T
                pl.BlockSpec((1, TR), full2),          # b2
            ],
            out_specs=[
                pl.BlockSpec((T * Bp, TR), full2),     # per-step outputs (flat)
                pl.BlockSpec((Bp, H), full2),          # h_T
                pl.BlockSpec((Bp, H), full2),          # c_T
            ],
            scratch_shapes=[
                pltpu.VMEM((T * Bp, H), jnp.float32),  # xg_i
                pltpu.VMEM((T * Bp, H), jnp.float32),  # xg_f
                pltpu.VMEM((T * Bp, H), jnp.float32),  # xg_g
                pltpu.VMEM((T * Bp, H), jnp.float32),  # xg_o
                pltpu.VMEM((T * Bp, H), jnp.float32),  # h_t collection for MLP
            ],
        ),
        compiler_params=pltpu.CompilerParams(
            dimension_semantics=("arbitrary",)),
    )(x_flat, h0_2d, c0_2d,
      params["w_ih_t"], params["w_hh_t"], b_comb,
      params["w1_t"], b1, params["w2_t"], b2)

    out = out_flat.reshape(T, Bp, TR)[:, :B, :]
    output = jnp.transpose(out, (1, 0, 2))       # back to (B, T, tr_count)
    return output, (hT[:B].reshape(1, B, H), cT[:B].reshape(1, B, H))


def init_params(key, inp_dim, rnn_h_dim, hidden_dim, tr_count):
    """Deterministic parameter init mimicking the PyTorch module's __init__."""
    ks = jax.random.split(key, 8)
    H = rnn_h_dim
    # PyTorch LSTM default: uniform(-1/sqrt(H), 1/sqrt(H))
    s = 1.0 / jnp.sqrt(H)
    w_ih = jax.random.uniform(ks[0], (4 * H, inp_dim), jnp.float32, -s, s)
    w_hh = jax.random.uniform(ks[1], (4 * H, H), jnp.float32, -s, s)
    b_ih = jax.random.uniform(ks[2], (4 * H,), jnp.float32, -s, s)
    b_hh = jax.random.uniform(ks[3], (4 * H,), jnp.float32, -s, s)
    # Xavier uniform for MLP weights, default (uniform) init for biases.
    g1 = jnp.sqrt(6.0 / (rnn_h_dim + hidden_dim))
    w1 = jax.random.uniform(ks[4], (hidden_dim, rnn_h_dim), jnp.float32, -g1, g1)
    b1 = jax.random.uniform(ks[5], (hidden_dim,), jnp.float32,
                            -1.0 / jnp.sqrt(rnn_h_dim), 1.0 / jnp.sqrt(rnn_h_dim))
    g2 = jnp.sqrt(6.0 / (hidden_dim + tr_count))
    w2 = jax.random.uniform(ks[6], (tr_count, hidden_dim), jnp.float32, -g2, g2)
    b2 = jax.random.uniform(ks[7], (tr_count,), jnp.float32,
                            -1.0 / jnp.sqrt(hidden_dim), 1.0 / jnp.sqrt(hidden_dim))
    return {
        "w_ih_t": w_ih.T, "w_hh_t": w_hh.T, "b_ih": b_ih, "b_hh": b_hh,
        "w1_t": w1.T, "b1": b1, "w2_t": w2.T, "b2": b2,
    }


def _reference_forward(x, hidden_state, params):
    """Pure-JAX reference (lax.scan LSTM + MLP) for correctness checking."""
    h0, c0 = hidden_state
    B, T, I = x.shape
    H = h0.shape[-1]
    h = h0.reshape(B, H)
    c = c0.reshape(B, H)
    b = params["b_ih"] + params["b_hh"]

    def step(carry, x_t):
        h, c = carry
        gates = x_t @ params["w_ih_t"] + h @ params["w_hh_t"] + b
        i_g = jax.nn.sigmoid(gates[:, 0 * H:1 * H])
        f_g = jax.nn.sigmoid(gates[:, 1 * H:2 * H])
        g_g = jnp.tanh(gates[:, 2 * H:3 * H])
        o_g = jax.nn.sigmoid(gates[:, 3 * H:4 * H])
        c_new = f_g * c + i_g * g_g
        h_new = o_g * jnp.tanh(c_new)
        return (h_new, c_new), h_new

    (hT, cT), hs = jax.lax.scan(step, (h, c), jnp.transpose(x, (1, 0, 2)))
    lstm_out = jnp.transpose(hs, (1, 0, 2))
    hid = jnp.maximum(lstm_out @ params["w1_t"] + params["b1"], 0.0)
    out = hid @ params["w2_t"] + params["b2"]
    return out, (hT.reshape(1, B, H), cT.reshape(1, B, H))


if __name__ == "__main__":
    B, T = 2, 8
    inp_dim, rnn_h_dim, hidden_dim, tr_count = 16, 32, 32, 4

    key = jax.random.PRNGKey(0)
    k_x, k_h, k_c, k_p = jax.random.split(key, 4)

    x = jax.random.normal(k_x, (B, T, inp_dim), jnp.float32)
    # Non-zero hidden state to exercise the h0/c0 path (init_hidden would be zeros).
    h0 = jax.random.normal(k_h, (1, B, rnn_h_dim), jnp.float32) * 0.1
    c0 = jax.random.normal(k_c, (1, B, rnn_h_dim), jnp.float32) * 0.1

    params = init_params(k_p, inp_dim, rnn_h_dim, hidden_dim, tr_count)

    out, (hT, cT) = drqn_forward(x, (h0, c0), params)
    jax.block_until_ready((out, hT, cT))

    ref_out, (ref_hT, ref_cT) = _reference_forward(x, (h0, c0), params)
    assert out.shape == (B, T, tr_count)
    assert hT.shape == (1, B, rnn_h_dim) and cT.shape == (1, B, rnn_h_dim)
    assert jnp.allclose(out, ref_out, atol=1e-5, rtol=1e-5)
    assert jnp.allclose(hT, ref_hT, atol=1e-5, rtol=1e-5)
    assert jnp.allclose(cT, ref_cT, atol=1e-5, rtol=1e-5)

    print("KERNEL_OK")
</pallas_src>

<mosaic_0001>
module attributes {stable_mosaic.version = 11 : i64} {
  func.func @_drqn_kernel(%arg0: i32, %arg1: memref<64x16xf32, #tpu.memory_space<vmem>>, %arg2: memref<8x32xf32, #tpu.memory_space<vmem>>, %arg3: memref<8x32xf32, #tpu.memory_space<vmem>>, %arg4: memref<16x128xf32, #tpu.memory_space<vmem>>, %arg5: memref<32x128xf32, #tpu.memory_space<vmem>>, %arg6: memref<1x128xf32, #tpu.memory_space<vmem>>, %arg7: memref<32x32xf32, #tpu.memory_space<vmem>>, %arg8: memref<1x32xf32, #tpu.memory_space<vmem>>, %arg9: memref<32x4xf32, #tpu.memory_space<vmem>>, %arg10: memref<1x4xf32, #tpu.memory_space<vmem>>, %arg11: memref<64x4xf32, #tpu.memory_space<vmem>>, %arg12: memref<8x32xf32, #tpu.memory_space<vmem>>, %arg13: memref<8x32xf32, #tpu.memory_space<vmem>>, %arg14: memref<64x32xf32, #tpu.memory_space<vmem>>, %arg15: memref<64x32xf32, #tpu.memory_space<vmem>>, %arg16: memref<64x32xf32, #tpu.memory_space<vmem>>, %arg17: memref<64x32xf32, #tpu.memory_space<vmem>>, %arg18: memref<64x32xf32, #tpu.memory_space<vmem>>) attributes {dimension_semantics = [#tpu.dimension_semantics<arbitrary>], iteration_bounds = array<i64: 1>, scalar_prefetch = 0 : i64, scratch_operands = 5 : i64, tpu.core_type = #tpu.core_type<tc>, window_params = [{pipeline_mode = #tpu.pipeline_mode<synchronous>, transform_indices = @transform_0, window_bounds = array<i64: 64, 16>}, {pipeline_mode = #tpu.pipeline_mode<synchronous>, transform_indices = @transform_1, window_bounds = array<i64: 8, 32>}, {pipeline_mode = #tpu.pipeline_mode<synchronous>, transform_indices = @transform_2, window_bounds = array<i64: 8, 32>}, {pipeline_mode = #tpu.pipeline_mode<synchronous>, transform_indices = @transform_3, window_bounds = array<i64: 16, 128>}, {pipeline_mode = #tpu.pipeline_mode<synchronous>, transform_indices = @transform_4, window_bounds = array<i64: 32, 128>}, {pipeline_mode = #tpu.pipeline_mode<synchronous>, transform_indices = @transform_5, window_bounds = array<i64: 1, 128>}, {pipeline_mode = #tpu.pipeline_mode<synchronous>, transform_indices = @transform_6, window_bounds = array<i64: 32, 32>}, {pipeline_mode = #tpu.pipeline_mode<synchronous>, transform_indices = @transform_7, window_bounds = array<i64: 1, 32>}, {pipeline_mode = #tpu.pipeline_mode<synchronous>, transform_indices = @transform_8, window_bounds = array<i64: 32, 4>}, {pipeline_mode = #tpu.pipeline_mode<synchronous>, transform_indices = @transform_9, window_bounds = array<i64: 1, 4>}, {pipeline_mode = #tpu.pipeline_mode<synchronous>, transform_indices = @transform_10, window_bounds = array<i64: 64, 4>}, {pipeline_mode = #tpu.pipeline_mode<synchronous>, transform_indices = @transform_11, window_bounds = array<i64: 8, 32>}, {pipeline_mode = #tpu.pipeline_mode<synchronous>, transform_indices = @transform_12, window_bounds = array<i64: 8, 32>}]} {
    %c0 = arith.constant 0 : index
    %c0_0 = arith.constant 0 : index
    %0 = vector.load %arg1[%c0, %c0_0] : memref<64x16xf32, #tpu.memory_space<vmem>>, vector<64x16xf32>
    %c0_1 = arith.constant 0 : index
    %c0_2 = arith.constant 0 : index
    %1 = vector.load %arg4[%c0_1, %c0_2] : memref<16x128xf32, #tpu.memory_space<vmem>>, vector<16x128xf32>
    %cst = arith.constant dense<0.000000e+00> : vector<64x128xf32>
    %2 = tpu.matmul %0, %1, %cst {dimension_numbers = #tpu.dot_dimension_numbers<[1], [0], [0], [1], [0, 0, 1, 1], [], []>} : vector<64x16xf32>, vector<16x128xf32>, vector<64x128xf32> -> vector<64x128xf32>
    %c0_3 = arith.constant 0 : index
    %c0_4 = arith.constant 0 : index
    %3 = vector.load %arg6[%c0_3, %c0_4] : memref<1x128xf32, #tpu.memory_space<vmem>>, vector<1x128xf32>
    %4 = vector.broadcast %3 : vector<1x128xf32> to vector<64x128xf32>
    %5 = arith.addf %2, %4 : vector<64x128xf32>
    %6 = vector.extract_strided_slice %5 {offsets = [0, 0], sizes = [64, 32], strides = [1, 1]} : vector<64x128xf32> to vector<64x32xf32>
    %c0_5 = arith.constant 0 : index
    %c0_6 = arith.constant 0 : index
    %7 = vector.load %arg14[%c0_5, %c0_6] : memref<64x32xf32, #tpu.memory_space<vmem>>, vector<64x32xf32>
    tpu.vector_store %arg14[%c0_5, %c0_6], %6 {strides = array<i32>} : memref<64x32xf32, #tpu.memory_space<vmem>>, vector<64x32xf32>,
    %8 = vector.extract_strided_slice %5 {offsets = [0, 32], sizes = [64, 32], strides = [1, 1]} : vector<64x128xf32> to vector<64x32xf32>
    %c0_7 = arith.constant 0 : index
    %c0_8 = arith.constant 0 : index
    %9 = vector.load %arg15[%c0_7, %c0_8] : memref<64x32xf32, #tpu.memory_space<vmem>>, vector<64x32xf32>
    tpu.vector_store %arg15[%c0_7, %c0_8], %8 {strides = array<i32>} : memref<64x32xf32, #tpu.memory_space<vmem>>, vector<64x32xf32>,
    %10 = vector.extract_strided_slice %5 {offsets = [0, 64], sizes = [64, 32], strides = [1, 1]} : vector<64x128xf32> to vector<64x32xf32>
    %c0_9 = arith.constant 0 : index
    %c0_10 = arith.constant 0 : index
    %11 = vector.load %arg16[%c0_9, %c0_10] : memref<64x32xf32, #tpu.memory_space<vmem>>, vector<64x32xf32>
    tpu.vector_store %arg16[%c0_9, %c0_10], %10 {strides = array<i32>} : memref<64x32xf32, #tpu.memory_space<vmem>>, vector<64x32xf32>,
    %12 = vector.extract_strided_slice %5 {offsets = [0, 96], sizes = [64, 32], strides = [1, 1]} : vector<64x128xf32> to vector<64x32xf32>
    %c0_11 = arith.constant 0 : index
    %c0_12 = arith.constant 0 : index
    %13 = vector.load %arg17[%c0_11, %c0_12] : memref<64x32xf32, #tpu.memory_space<vmem>>, vector<64x32xf32>
    tpu.vector_store %arg17[%c0_11, %c0_12], %12 {strides = array<i32>} : memref<64x32xf32, #tpu.memory_space<vmem>>, vector<64x32xf32>,
    %c0_13 = arith.constant 0 : index
    %c0_14 = arith.constant 0 : index
    %14 = vector.load %arg5[%c0_13, %c0_14] : memref<32x128xf32, #tpu.memory_space<vmem>>, vector<32x128xf32>
    %15 = vector.extract_strided_slice %14 {offsets = [0, 0], sizes = [32, 32], strides = [1, 1]} : vector<32x128xf32> to vector<32x32xf32>
    %16 = vector.extract_strided_slice %14 {offsets = [0, 32], sizes = [32, 32], strides = [1, 1]} : vector<32x128xf32> to vector<32x32xf32>
    %17 = vector.extract_strided_slice %14 {offsets = [0, 64], sizes = [32, 32], strides = [1, 1]} : vector<32x128xf32> to vector<32x32xf32>
    %18 = vector.extract_strided_slice %14 {offsets = [0, 96], sizes = [32, 32], strides = [1, 1]} : vector<32x128xf32> to vector<32x32xf32>
    %c0_15 = arith.constant 0 : index
    %c0_16 = arith.constant 0 : index
    %19 = vector.load %arg2[%c0_15, %c0_16] : memref<8x32xf32, #tpu.memory_space<vmem>>, vector<8x32xf32>
    %c0_17 = arith.constant 0 : index
    %c0_18 = arith.constant 0 : index
    %20 = vector.load %arg3[%c0_17, %c0_18] : memref<8x32xf32, #tpu.memory_space<vmem>>, vector<8x32xf32>
    %c0_i32 = arith.constant 0 : i32
    %c8_i32 = arith.constant 8 : i32
    %21 = arith.muli %c0_i32, %c8_i32 : i32
    %22 = tpu.assume_multiple %21, 8 : i32
    %23 = arith.index_cast %22 : i32 to index
    %c0_19 = arith.constant 0 : index
    %24 = vector.load %arg14[%23, %c0_19] : memref<64x32xf32, #tpu.memory_space<vmem>>, vector<8x32xf32>
    %cst_20 = arith.constant dense<0.000000e+00> : vector<8x32xf32>
    %25 = tpu.matmul %19, %15, %cst_20 {dimension_numbers = #tpu.dot_dimension_numbers<[1], [0], [0], [1], [0, 0, 1, 1], [], []>} : vector<8x32xf32>, vector<32x32xf32>, vector<8x32xf32> -> vector<8x32xf32>
    %26 = arith.addf %24, %25 : vector<8x32xf32>
    %27 = arith.index_cast %22 : i32 to index
    %c0_21 = arith.constant 0 : index
    %28 = vector.load %arg15[%27, %c0_21] : memref<64x32xf32, #tpu.memory_space<vmem>>, vector<8x32xf32>
    %cst_22 = arith.constant dense<0.000000e+00> : vector<8x32xf32>
    %29 = tpu.matmul %19, %16, %cst_22 {dimension_numbers = #tpu.dot_dimension_numbers<[1], [0], [0], [1], [0, 0, 1, 1], [], []>} : vector<8x32xf32>, vector<32x32xf32>, vector<8x32xf32> -> vector<8x32xf32>
    %30 = arith.addf %28, %29 : vector<8x32xf32>
    %31 = arith.index_cast %22 : i32 to index
    %c0_23 = arith.constant 0 : index
    %32 = vector.load %arg16[%31, %c0_23] : memref<64x32xf32, #tpu.memory_space<vmem>>, vector<8x32xf32>
    %cst_24 = arith.constant dense<0.000000e+00> : vector<8x32xf32>
    %33 = tpu.matmul %19, %17, %cst_24 {dimension_numbers = #tpu.dot_dimension_numbers<[1], [0], [0], [1], [0, 0, 1, 1], [], []>} : vector<8x32xf32>, vector<32x32xf32>, vector<8x32xf32> -> vector<8x32xf32>
    %34 = arith.addf %32, %33 : vector<8x32xf32>
    %35 = arith.index_cast %22 : i32 to index
    %c0_25 = arith.constant 0 : index
    %36 = vector.load %arg17[%35, %c0_25] : memref<64x32xf32, #tpu.memory_space<vmem>>, vector<8x32xf32>
    %cst_26 = arith.constant dense<0.000000e+00> : vector<8x32xf32>
    %37 = tpu.matmul %19, %18, %cst_26 {dimension_numbers = #tpu.dot_dimension_numbers<[1], [0], [0], [1], [0, 0, 1, 1], [], []>} : vector<8x32xf32>, vector<32x32xf32>, vector<8x32xf32> -> vector<8x32xf32>
    %38 = arith.addf %36, %37 : vector<8x32xf32>
    %39 = arith.negf %26 : vector<8x32xf32>
    %40 = math.exp %39 : vector<8x32xf32>
    %cst_27 = arith.constant 1.000000e+00 : f32
    %41 = vector.broadcast %cst_27 : f32 to vector<8x32xf32>
    %42 = arith.addf %41, %40 : vector<8x32xf32>
    %43 = arith.divf %41, %42 : vector<8x32xf32>
    %44 = arith.negf %30 : vector<8x32xf32>
    %45 = math.exp %44 : vector<8x32xf32>
    %cst_28 = arith.constant 1.000000e+00 : f32
    %46 = vector.broadcast %cst_28 : f32 to vector<8x32xf32>
    %47 = arith.addf %46, %45 : vector<8x32xf32>
    %48 = arith.divf %46, %47 : vector<8x32xf32>
    %49 = math.tanh %34 : vector<8x32xf32>
    %50 = arith.negf %38 : vector<8x32xf32>
    %51 = math.exp %50 : vector<8x32xf32>
    %cst_29 = arith.constant 1.000000e+00 : f32
    %52 = vector.broadcast %cst_29 : f32 to vector<8x32xf32>
    %53 = arith.addf %52, %51 : vector<8x32xf32>
    %54 = arith.divf %52, %53 : vector<8x32xf32>
    %55 = arith.mulf %48, %20 : vector<8x32xf32>
    %56 = arith.mulf %43, %49 : vector<8x32xf32>
    %57 = arith.addf %55, %56 : vector<8x32xf32>
    %58 = math.tanh %57 : vector<8x32xf32>
    %59 = arith.mulf %54, %58 : vector<8x32xf32>
    %60 = arith.index_cast %22 : i32 to index
    %c0_30 = arith.constant 0 : index
    %61 = vector.load %arg18[%60, %c0_30] : memref<64x32xf32, #tpu.memory_space<vmem>>, vector<8x32xf32>
    tpu.vector_store %arg18[%60, %c0_30], %59 {strides = array<i32>} : memref<64x32xf32, #tpu.memory_space<vmem>>, vector<8x32xf32>,
    %c1_i32 = arith.constant 1 : i32
    %c8_i32_31 = arith.constant 8 : i32
    %62 = arith.muli %c1_i32, %c8_i32_31 : i32
    %63 = tpu.assume_multiple %62, 8 : i32
    %64 = arith.index_cast %63 : i32 to index
    %c0_32 = arith.constant 0 : index
    %65 = vector.load %arg14[%64, %c0_32] : memref<64x32xf32, #tpu.memory_space<vmem>>, vector<8x32xf32>
    %cst_33 = arith.constant dense<0.000000e+00> : vector<8x32xf32>
    %66 = tpu.matmul %59, %15, %cst_33 {dimension_numbers = #tpu.dot_dimension_numbers<[1], [0], [0], [1], [0, 0, 1, 1], [], []>} : vector<8x32xf32>, vector<32x32xf32>, vector<8x32xf32> -> vector<8x32xf32>
    %67 = arith.addf %65, %66 : vector<8x32xf32>
    %68 = arith.index_cast %63 : i32 to index
    %c0_34 = arith.constant 0 : index
    %69 = vector.load %arg15[%68, %c0_34] : memref<64x32xf32, #tpu.memory_space<vmem>>, vector<8x32xf32>
    %cst_35 = arith.constant dense<0.000000e+00> : vector<8x32xf32>
    %70 = tpu.matmul %59, %16, %cst_35 {dimension_numbers = #tpu.dot_dimension_numbers<[1], [0], [0], [1], [0, 0, 1, 1], [], []>} : vector<8x32xf32>, vector<32x32xf32>, vector<8x32xf32> -> vector<8x32xf32>
    %71 = arith.addf %69, %70 : vector<8x32xf32>
    %72 = arith.index_cast %63 : i32 to index
    %c0_36 = arith.constant 0 : index
    %73 = vector.load %arg16[%72, %c0_36] : memref<64x32xf32, #tpu.memory_space<vmem>>, vector<8x32xf32>
    %cst_37 = arith.constant dense<0.000000e+00> : vector<8x32xf32>
    %74 = tpu.matmul %59, %17, %cst_37 {dimension_numbers = #tpu.dot_dimension_numbers<[1], [0], [0], [1], [0, 0, 1, 1], [], []>} : vector<8x32xf32>, vector<32x32xf32>, vector<8x32xf32> -> vector<8x32xf32>
    %75 = arith.addf %73, %74 : vector<8x32xf32>
    %76 = arith.index_cast %63 : i32 to index
    %c0_38 = arith.constant 0 : index
    %77 = vector.load %arg17[%76, %c0_38] : memref<64x32xf32, #tpu.memory_space<vmem>>, vector<8x32xf32>
    %cst_39 = arith.constant dense<0.000000e+00> : vector<8x32xf32>
    %78 = tpu.matmul %59, %18, %cst_39 {dimension_numbers = #tpu.dot_dimension_numbers<[1], [0], [0], [1], [0, 0, 1, 1], [], []>} : vector<8x32xf32>, vector<32x32xf32>, vector<8x32xf32> -> vector<8x32xf32>
    %79 = arith.addf %77, %78 : vector<8x32xf32>
    %80 = arith.negf %67 : vector<8x32xf32>
    %81 = math.exp %80 : vector<8x32xf32>
    %cst_40 = arith.constant 1.000000e+00 : f32
    %82 = vector.broadcast %cst_40 : f32 to vector<8x32xf32>
    %83 = arith.addf %82, %81 : vector<8x32xf32>
    %84 = arith.divf %82, %83 : vector<8x32xf32>
    %85 = arith.negf %71 : vector<8x32xf32>
    %86 = math.exp %85 : vector<8x32xf32>
    %cst_41 = arith.constant 1.000000e+00 : f32
    %87 = vector.broadcast %cst_41 : f32 to vector<8x32xf32>
    %88 = arith.addf %87, %86 : vector<8x32xf32>
    %89 = arith.divf %87, %88 : vector<8x32xf32>
    %90 = math.tanh %75 : vector<8x32xf32>
    %91 = arith.negf %79 : vector<8x32xf32>
    %92 = math.exp %91 : vector<8x32xf32>
    %cst_42 = arith.constant 1.000000e+00 : f32
    %93 = vector.broadcast %cst_42 : f32 to vector<8x32xf32>
    %94 = arith.addf %93, %92 : vector<8x32xf32>
    %95 = arith.divf %93, %94 : vector<8x32xf32>
    %96 = arith.mulf %89, %57 : vector<8x32xf32>
    %97 = arith.mulf %84, %90 : vector<8x32xf32>
    %98 = arith.addf %96, %97 : vector<8x32xf32>
    %99 = math.tanh %98 : vector<8x32xf32>
    %100 = arith.mulf %95, %99 : vector<8x32xf32>
    %101 = arith.index_cast %63 : i32 to index
    %c0_43 = arith.constant 0 : index
    %102 = vector.load %arg18[%101, %c0_43] : memref<64x32xf32, #tpu.memory_space<vmem>>, vector<8x32xf32>
    tpu.vector_store %arg18[%101, %c0_43], %100 {strides = array<i32>} : memref<64x32xf32, #tpu.memory_space<vmem>>, vector<8x32xf32>,
    %c2_i32 = arith.constant 2 : i32
    %c8_i32_44 = arith.constant 8 : i32
    %103 = arith.muli %c2_i32, %c8_i32_44 : i32
    %104 = tpu.assume_multiple %103, 8 : i32
    %105 = arith.index_cast %104 : i32 to index
    %c0_45 = arith.constant 0 : index
    %106 = vector.load %arg14[%105, %c0_45] : memref<64x32xf32, #tpu.memory_space<vmem>>, vector<8x32xf32>
    %cst_46 = arith.constant dense<0.000000e+00> : vector<8x32xf32>
    %107 = tpu.matmul %100, %15, %cst_46 {dimension_numbers = #tpu.dot_dimension_numbers<[1], [0], [0], [1], [0, 0, 1, 1], [], []>} : vector<8x32xf32>, vector<32x32xf32>, vector<8x32xf32> -> vector<8x32xf32>
    %108 = arith.addf %106, %107 : vector<8x32xf32>
    %109 = arith.index_cast %104 : i32 to index
    %c0_47 = arith.constant 0 : index
    %110 = vector.load %arg15[%109, %c0_47] : memref<64x32xf32, #tpu.memory_space<vmem>>, vector<8x32xf32>
    %cst_48 = arith.constant dense<0.000000e+00> : vector<8x32xf32>
    %111 = tpu.matmul %100, %16, %cst_48 {dimension_numbers = #tpu.dot_dimension_numbers<[1], [0], [0], [1], [0, 0, 1, 1], [], []>} : vector<8x32xf32>, vector<32x32xf32>, vector<8x32xf32> -> vector<8x32xf32>
    %112 = arith.addf %110, %111 : vector<8x32xf32>
    %113 = arith.index_cast %104 : i32 to index
    %c0_49 = arith.constant 0 : index
    %114 = vector.load %arg16[%113, %c0_49] : memref<64x32xf32, #tpu.memory_space<vmem>>, vector<8x32xf32>
    %cst_50 = arith.constant dense<0.000000e+00> : vector<8x32xf32>
    %115 = tpu.matmul %100, %17, %cst_50 {dimension_numbers = #tpu.dot_dimension_numbers<[1], [0], [0], [1], [0, 0, 1, 1], [], []>} : vector<8x32xf32>, vector<32x32xf32>, vector<8x32xf32> -> vector<8x32xf32>
    %116 = arith.addf %114, %115 : vector<8x32xf32>
    %117 = arith.index_cast %104 : i32 to index
    %c0_51 = arith.constant 0 : index
    %118 = vector.load %arg17[%117, %c0_51] : memref<64x32xf32, #tpu.memory_space<vmem>>, vector<8x32xf32>
    %cst_52 = arith.constant dense<0.000000e+00> : vector<8x32xf32>
    %119 = tpu.matmul %100, %18, %cst_52 {dimension_numbers = #tpu.dot_dimension_numbers<[1], [0], [0], [1], [0, 0, 1, 1], [], []>} : vector<8x32xf32>, vector<32x32xf32>, vector<8x32xf32> -> vector<8x32xf32>
    %120 = arith.addf %118, %119 : vector<8x32xf32>
    %121 = arith.negf %108 : vector<8x32xf32>
    %122 = math.exp %121 : vector<8x32xf32>
    %cst_53 = arith.constant 1.000000e+00 : f32
    %123 = vector.broadcast %cst_53 : f32 to vector<8x32xf32>
    %124 = arith.addf %123, %122 : vector<8x32xf32>
    %125 = arith.divf %123, %124 : vector<8x32xf32>
    %126 = arith.negf %112 : vector<8x32xf32>
    %127 = math.exp %126 : vector<8x32xf32>
    %cst_54 = arith.constant 1.000000e+00 : f32
    %128 = vector.broadcast %cst_54 : f32 to vector<8x32xf32>
    %129 = arith.addf %128, %127 : vector<8x32xf32>
    %130 = arith.divf %128, %129 : vector<8x32xf32>
    %131 = math.tanh %116 : vector<8x32xf32>
    %132 = arith.negf %120 : vector<8x32xf32>
    %133 = math.exp %132 : vector<8x32xf32>
    %cst_55 = arith.constant 1.000000e+00 : f32
    %134 = vector.broadcast %cst_55 : f32 to vector<8x32xf32>
    %135 = arith.addf %134, %133 : vector<8x32xf32>
    %136 = arith.divf %134, %135 : vector<8x32xf32>
    %137 = arith.mulf %130, %98 : vector<8x32xf32>
    %138 = arith.mulf %125, %131 : vector<8x32xf32>
    %139 = arith.addf %137, %138 : vector<8x32xf32>
    %140 = math.tanh %139 : vector<8x32xf32>
    %141 = arith.mulf %136, %140 : vector<8x32xf32>
    %142 = arith.index_cast %104 : i32 to index
    %c0_56 = arith.constant 0 : index
    %143 = vector.load %arg18[%142, %c0_56] : memref<64x32xf32, #tpu.memory_space<vmem>>, vector<8x32xf32>
    tpu.vector_store %arg18[%142, %c0_56], %141 {strides = array<i32>} : memref<64x32xf32, #tpu.memory_space<vmem>>, vector<8x32xf32>,
    %c3_i32 = arith.constant 3 : i32
    %c8_i32_57 = arith.constant 8 : i32
    %144 = arith.muli %c3_i32, %c8_i32_57 : i32
    %145 = tpu.assume_multiple %144, 8 : i32
    %146 = arith.index_cast %145 : i32 to index
    %c0_58 = arith.constant 0 : index
    %147 = vector.load %arg14[%146, %c0_58] : memref<64x32xf32, #tpu.memory_space<vmem>>, vector<8x32xf32>
    %cst_59 = arith.constant dense<0.000000e+00> : vector<8x32xf32>
    %148 = tpu.matmul %141, %15, %cst_59 {dimension_numbers = #tpu.dot_dimension_numbers<[1], [0], [0], [1], [0, 0, 1, 1], [], []>} : vector<8x32xf32>, vector<32x32xf32>, vector<8x32xf32> -> vector<8x32xf32>
    %149 = arith.addf %147, %148 : vector<8x32xf32>
    %150 = arith.index_cast %145 : i32 to index
    %c0_60 = arith.constant 0 : index
    %151 = vector.load %arg15[%150, %c0_60] : memref<64x32xf32, #tpu.memory_space<vmem>>, vector<8x32xf32>
    %cst_61 = arith.constant dense<0.000000e+00> : vector<8x32xf32>
    %152 = tpu.matmul %141, %16, %cst_61 {dimension_numbers = #tpu.dot_dimension_numbers<[1], [0], [0], [1], [0, 0, 1, 1], [], []>} : vector<8x32xf32>, vector<32x32xf32>, vector<8x32xf32> -> vector<8x32xf32>
    %153 = arith.addf %151, %152 : vector<8x32xf32>
    %154 = arith.index_cast %145 : i32 to index
    %c0_62 = arith.constant 0 : index
    %155 = vector.load %arg16[%154, %c0_62] : memref<64x32xf32, #tpu.memory_space<vmem>>, vector<8x32xf32>
    %cst_63 = arith.constant dense<0.000000e+00> : vector<8x32xf32>
    %156 = tpu.matmul %141, %17, %cst_63 {dimension_numbers = #tpu.dot_dimension_numbers<[1], [0], [0], [1], [0, 0, 1, 1], [], []>} : vector<8x32xf32>, vector<32x32xf32>, vector<8x32xf32> -> vector<8x32xf32>
    %157 = arith.addf %155, %156 : vector<8x32xf32>
    %158 = arith.index_cast %145 : i32 to index
    %c0_64 = arith.constant 0 : index
    %159 = vector.load %arg17[%158, %c0_64] : memref<64x32xf32, #tpu.memory_space<vmem>>, vector<8x32xf32>
    %cst_65 = arith.constant dense<0.000000e+00> : vector<8x32xf32>
    %160 = tpu.matmul %141, %18, %cst_65 {dimension_numbers = #tpu.dot_dimension_numbers<[1], [0], [0], [1], [0, 0, 1, 1], [], []>} : vector<8x32xf32>, vector<32x32xf32>, vector<8x32xf32> -> vector<8x32xf32>
    %161 = arith.addf %159, %160 : vector<8x32xf32>
    %162 = arith.negf %149 : vector<8x32xf32>
    %163 = math.exp %162 : vector<8x32xf32>
    %cst_66 = arith.constant 1.000000e+00 : f32
    %164 = vector.broadcast %cst_66 : f32 to vector<8x32xf32>
    %165 = arith.addf %164, %163 : vector<8x32xf32>
    %166 = arith.divf %164, %165 : vector<8x32xf32>
    %167 = arith.negf %153 : vector<8x32xf32>
    %168 = math.exp %167 : vector<8x32xf32>
    %cst_67 = arith.constant 1.000000e+00 : f32
    %169 = vector.broadcast %cst_67 : f32 to vector<8x32xf32>
    %170 = arith.addf %169, %168 : vector<8x32xf32>
    %171 = arith.divf %169, %170 : vector<8x32xf32>
    %172 = math.tanh %157 : vector<8x32xf32>
    %173 = arith.negf %161 : vector<8x32xf32>
    %174 = math.exp %173 : vector<8x32xf32>
    %cst_68 = arith.constant 1.000000e+00 : f32
    %175 = vector.broadcast %cst_68 : f32 to vector<8x32xf32>
    %176 = arith.addf %175, %174 : vector<8x32xf32>
    %177 = arith.divf %175, %176 : vector<8x32xf32>
    %178 = arith.mulf %171, %139 : vector<8x32xf32>
    %179 = arith.mulf %166, %172 : vector<8x32xf32>
    %180 = arith.addf %178, %179 : vector<8x32xf32>
    %181 = math.tanh %180 : vector<8x32xf32>
    %182 = arith.mulf %177, %181 : vector<8x32xf32>
    %183 = arith.index_cast %145 : i32 to index
    %c0_69 = arith.constant 0 : index
    %184 = vector.load %arg18[%183, %c0_69] : memref<64x32xf32, #tpu.memory_space<vmem>>, vector<8x32xf32>
    tpu.vector_store %arg18[%183, %c0_69], %182 {strides = array<i32>} : memref<64x32xf32, #tpu.memory_space<vmem>>, vector<8x32xf32>,
    %c4_i32 = arith.constant 4 : i32
    %c8_i32_70 = arith.constant 8 : i32
    %185 = arith.muli %c4_i32, %c8_i32_70 : i32
    %186 = tpu.assume_multiple %185, 8 : i32
    %187 = arith.index_cast %186 : i32 to index
    %c0_71 = arith.constant 0 : index
    %188 = vector.load %arg14[%187, %c0_71] : memref<64x32xf32, #tpu.memory_space<vmem>>, vector<8x32xf32>
    %cst_72 = arith.constant dense<0.000000e+00> : vector<8x32xf32>
    %189 = tpu.matmul %182, %15, %cst_72 {dimension_numbers = #tpu.dot_dimension_numbers<[1], [0], [0], [1], [0, 0, 1, 1], [], []>} : vector<8x32xf32>, vector<32x32xf32>, vector<8x32xf32> -> vector<8x32xf32>
    %190 = arith.addf %188, %189 : vector<8x32xf32>
    %191 = arith.index_cast %186 : i32 to index
    %c0_73 = arith.constant 0 : index
    %192 = vector.load %arg15[%191, %c0_73] : memref<64x32xf32, #tpu.memory_space<vmem>>, vector<8x32xf32>
    %cst_74 = arith.constant dense<0.000000e+00> : vector<8x32xf32>
    %193 = tpu.matmul %182, %16, %cst_74 {dimension_numbers = #tpu.dot_dimension_numbers<[1], [0], [0], [1], [0, 0, 1, 1], [], []>} : vector<8x32xf32>, vector<32x32xf32>, vector<8x32xf32> -> vector<8x32xf32>
    %194 = arith.addf %192, %193 : vector<8x32xf32>
    %195 = arith.index_cast %186 : i32 to index
    %c0_75 = arith.constant 0 : index
    %196 = vector.load %arg16[%195, %c0_75] : memref<64x32xf32, #tpu.memory_space<vmem>>, vector<8x32xf32>
    %cst_76 = arith.constant dense<0.000000e+00> : vector<8x32xf32>
    %197 = tpu.matmul %182, %17, %cst_76 {dimension_numbers = #tpu.dot_dimension_numbers<[1], [0], [0], [1], [0, 0, 1, 1], [], []>} : vector<8x32xf32>, vector<32x32xf32>, vector<8x32xf32> -> vector<8x32xf32>
    %198 = arith.addf %196, %197 : vector<8x32xf32>
    %199 = arith.index_cast %186 : i32 to index
    %c0_77 = arith.constant 0 : index
    %200 = vector.load %arg17[%199, %c0_77] : memref<64x32xf32, #tpu.memory_space<vmem>>, vector<8x32xf32>
    %cst_78 = arith.constant dense<0.000000e+00> : vector<8x32xf32>
    %201 = tpu.matmul %182, %18, %cst_78 {dimension_numbers = #tpu.dot_dimension_numbers<[1], [0], [0], [1], [0, 0, 1, 1], [], []>} : vector<8x32xf32>, vector<32x32xf32>, vector<8x32xf32> -> vector<8x32xf32>
    %202 = arith.addf %200, %201 : vector<8x32xf32>
    %203 = arith.negf %190 : vector<8x32xf32>
    %204 = math.exp %203 : vector<8x32xf32>
    %cst_79 = arith.constant 1.000000e+00 : f32
    %205 = vector.broadcast %cst_79 : f32 to vector<8x32xf32>
    %206 = arith.addf %205, %204 : vector<8x32xf32>
    %207 = arith.divf %205, %206 : vector<8x32xf32>
    %208 = arith.negf %194 : vector<8x32xf32>
    %209 = math.exp %208 : vector<8x32xf32>
    %cst_80 = arith.constant 1.000000e+00 : f32
    %210 = vector.broadcast %cst_80 : f32 to vector<8x32xf32>
    %211 = arith.addf %210, %209 : vector<8x32xf32>
    %212 = arith.divf %210, %211 : vector<8x32xf32>
    %213 = math.tanh %198 : vector<8x32xf32>
    %214 = arith.negf %202 : vector<8x32xf32>
    %215 = math.exp %214 : vector<8x32xf32>
    %cst_81 = arith.constant 1.000000e+00 : f32
    %216 = vector.broadcast %cst_81 : f32 to vector<8x32xf32>
    %217 = arith.addf %216, %215 : vector<8x32xf32>
    %218 = arith.divf %216, %217 : vector<8x32xf32>
    %219 = arith.mulf %212, %180 : vector<8x32xf32>
    %220 = arith.mulf %207, %213 : vector<8x32xf32>
    %221 = arith.addf %219, %220 : vector<8x32xf32>
    %222 = math.tanh %221 : vector<8x32xf32>
    %223 = arith.mulf %218, %222 : vector<8x32xf32>
    %224 = arith.index_cast %186 : i32 to index
    %c0_82 = arith.constant 0 : index
    %225 = vector.load %arg18[%224, %c0_82] : memref<64x32xf32, #tpu.memory_space<vmem>>, vector<8x32xf32>
    tpu.vector_store %arg18[%224, %c0_82], %223 {strides = array<i32>} : memref<64x32xf32, #tpu.memory_space<vmem>>, vector<8x32xf32>,
    %c5_i32 = arith.constant 5 : i32
    %c8_i32_83 = arith.constant 8 : i32
    %226 = arith.muli %c5_i32, %c8_i32_83 : i32
    %227 = tpu.assume_multiple %226, 8 : i32
    %228 = arith.index_cast %227 : i32 to index
    %c0_84 = arith.constant 0 : index
    %229 = vector.load %arg14[%228, %c0_84] : memref<64x32xf32, #tpu.memory_space<vmem>>, vector<8x32xf32>
    %cst_85 = arith.constant dense<0.000000e+00> : vector<8x32xf32>
    %230 = tpu.matmul %223, %15, %cst_85 {dimension_numbers = #tpu.dot_dimension_numbers<[1], [0], [0], [1], [0, 0, 1, 1], [], []>} : vector<8x32xf32>, vector<32x32xf32>, vector<8x32xf32> -> vector<8x32xf32>
    %231 = arith.addf %229, %230 : vector<8x32xf32>
    %232 = arith.index_cast %227 : i32 to index
    %c0_86 = arith.constant 0 : index
    %233 = vector.load %arg15[%232, %c0_86] : memref<64x32xf32, #tpu.memory_space<vmem>>, vector<8x32xf32>
    %cst_87 = arith.constant dense<0.000000e+00> : vector<8x32xf32>
    %234 = tpu.matmul %223, %16, %cst_87 {dimension_numbers = #tpu.dot_dimension_numbers<[1], [0], [0], [1], [0, 0, 1, 1], [], []>} : vector<8x32xf32>, vector<32x32xf32>, vector<8x32xf32> -> vector<8x32xf32>
    %235 = arith.addf %233, %234 : vector<8x32xf32>
    %236 = arith.index_cast %227 : i32 to index
    %c0_88 = arith.constant 0 : index
    %237 = vector.load %arg16[%236, %c0_88] : memref<64x32xf32, #tpu.memory_space<vmem>>, vector<8x32xf32>
    %cst_89 = arith.constant dense<0.000000e+00> : vector<8x32xf32>
    %238 = tpu.matmul %223, %17, %cst_89 {dimension_numbers = #tpu.dot_dimension_numbers<[1], [0], [0], [1], [0, 0, 1, 1], [], []>} : vector<8x32xf32>, vector<32x32xf32>, vector<8x32xf32> -> vector<8x32xf32>
    %239 = arith.addf %237, %238 : vector<8x32xf32>
    %240 = arith.index_cast %227 : i32 to index
    %c0_90 = arith.constant 0 : index
    %241 = vector.load %arg17[%240, %c0_90] : memref<64x32xf32, #tpu.memory_space<vmem>>, vector<8x32xf32>
    %cst_91 = arith.constant dense<0.000000e+00> : vector<8x32xf32>
    %242 = tpu.matmul %223, %18, %cst_91 {dimension_numbers = #tpu.dot_dimension_numbers<[1], [0], [0], [1], [0, 0, 1, 1], [], []>} : vector<8x32xf32>, vector<32x32xf32>, vector<8x32xf32> -> vector<8x32xf32>
    %243 = arith.addf %241, %242 : vector<8x32xf32>
    %244 = arith.negf %231 : vector<8x32xf32>
    %245 = math.exp %244 : vector<8x32xf32>
    %cst_92 = arith.constant 1.000000e+00 : f32
    %246 = vector.broadcast %cst_92 : f32 to vector<8x32xf32>
    %247 = arith.addf %246, %245 : vector<8x32xf32>
    %248 = arith.divf %246, %247 : vector<8x32xf32>
    %249 = arith.negf %235 : vector<8x32xf32>
    %250 = math.exp %249 : vector<8x32xf32>
    %cst_93 = arith.constant 1.000000e+00 : f32
    %251 = vector.broadcast %cst_93 : f32 to vector<8x32xf32>
    %252 = arith.addf %251, %250 : vector<8x32xf32>
    %253 = arith.divf %251, %252 : vector<8x32xf32>
    %254 = math.tanh %239 : vector<8x32xf32>
    %255 = arith.negf %243 : vector<8x32xf32>
    %256 = math.exp %255 : vector<8x32xf32>
    %cst_94 = arith.constant 1.000000e+00 : f32
    %257 = vector.broadcast %cst_94 : f32 to vector<8x32xf32>
    %258 = arith.addf %257, %256 : vector<8x32xf32>
    %259 = arith.divf %257, %258 : vector<8x32xf32>
    %260 = arith.mulf %253, %221 : vector<8x32xf32>
    %261 = arith.mulf %248, %254 : vector<8x32xf32>
    %262 = arith.addf %260, %261 : vector<8x32xf32>
    %263 = math.tanh %262 : vector<8x32xf32>
    %264 = arith.mulf %259, %263 : vector<8x32xf32>
    %265 = arith.index_cast %227 : i32 to index
    %c0_95 = arith.constant 0 : index
    %266 = vector.load %arg18[%265, %c0_95] : memref<64x32xf32, #tpu.memory_space<vmem>>, vector<8x32xf32>
    tpu.vector_store %arg18[%265, %c0_95], %264 {strides = array<i32>} : memref<64x32xf32, #tpu.memory_space<vmem>>, vector<8x32xf32>,
    %c6_i32 = arith.constant 6 : i32
    %c8_i32_96 = arith.constant 8 : i32
    %267 = arith.muli %c6_i32, %c8_i32_96 : i32
    %268 = tpu.assume_multiple %267, 8 : i32
    %269 = arith.index_cast %268 : i32 to index
    %c0_97 = arith.constant 0 : index
    %270 = vector.load %arg14[%269, %c0_97] : memref<64x32xf32, #tpu.memory_space<vmem>>, vector<8x32xf32>
    %cst_98 = arith.constant dense<0.000000e+00> : vector<8x32xf32>
    %271 = tpu.matmul %264, %15, %cst_98 {dimension_numbers = #tpu.dot_dimension_numbers<[1], [0], [0], [1], [0, 0, 1, 1], [], []>} : vector<8x32xf32>, vector<32x32xf32>, vector<8x32xf32> -> vector<8x32xf32>
    %272 = arith.addf %270, %271 : vector<8x32xf32>
    %273 = arith.index_cast %268 : i32 to index
    %c0_99 = arith.constant 0 : index
    %274 = vector.load %arg15[%273, %c0_99] : memref<64x32xf32, #tpu.memory_space<vmem>>, vector<8x32xf32>
    %cst_100 = arith.constant dense<0.000000e+00> : vector<8x32xf32>
    %275 = tpu.matmul %264, %16, %cst_100 {dimension_numbers = #tpu.dot_dimension_numbers<[1], [0], [0], [1], [0, 0, 1, 1], [], []>} : vector<8x32xf32>, vector<32x32xf32>, vector<8x32xf32> -> vector<8x32xf32>
    %276 = arith.addf %274, %275 : vector<8x32xf32>
    %277 = arith.index_cast %268 : i32 to index
    %c0_101 = arith.constant 0 : index
    %278 = vector.load %arg16[%277, %c0_101] : memref<64x32xf32, #tpu.memory_space<vmem>>, vector<8x32xf32>
    %cst_102 = arith.constant dense<0.000000e+00> : vector<8x32xf32>
    %279 = tpu.matmul %264, %17, %cst_102 {dimension_numbers = #tpu.dot_dimension_numbers<[1], [0], [0], [1], [0, 0, 1, 1], [], []>} : vector<8x32xf32>, vector<32x32xf32>, vector<8x32xf32> -> vector<8x32xf32>
    %280 = arith.addf %278, %279 : vector<8x32xf32>
    %281 = arith.index_cast %268 : i32 to index
    %c0_103 = arith.constant 0 : index
    %282 = vector.load %arg17[%281, %c0_103] : memref<64x32xf32, #tpu.memory_space<vmem>>, vector<8x32xf32>
    %cst_104 = arith.constant dense<0.000000e+00> : vector<8x32xf32>
    %283 = tpu.matmul %264, %18, %cst_104 {dimension_numbers = #tpu.dot_dimension_numbers<[1], [0], [0], [1], [0, 0, 1, 1], [], []>} : vector<8x32xf32>, vector<32x32xf32>, vector<8x32xf32> -> vector<8x32xf32>
    %284 = arith.addf %282, %283 : vector<8x32xf32>
    %285 = arith.negf %272 : vector<8x32xf32>
    %286 = math.exp %285 : vector<8x32xf32>
    %cst_105 = arith.constant 1.000000e+00 : f32
    %287 = vector.broadcast %cst_105 : f32 to vector<8x32xf32>
    %288 = arith.addf %287, %286 : vector<8x32xf32>
    %289 = arith.divf %287, %288 : vector<8x32xf32>
    %290 = arith.negf %276 : vector<8x32xf32>
    %291 = math.exp %290 : vector<8x32xf32>
    %cst_106 = arith.constant 1.000000e+00 : f32
    %292 = vector.broadcast %cst_106 : f32 to vector<8x32xf32>
    %293 = arith.addf %292, %291 : vector<8x32xf32>
    %294 = arith.divf %292, %293 : vector<8x32xf32>
    %295 = math.tanh %280 : vector<8x32xf32>
    %296 = arith.negf %284 : vector<8x32xf32>
    %297 = math.exp %296 : vector<8x32xf32>
    %cst_107 = arith.constant 1.000000e+00 : f32
    %298 = vector.broadcast %cst_107 : f32 to vector<8x32xf32>
    %299 = arith.addf %298, %297 : vector<8x32xf32>
    %300 = arith.divf %298, %299 : vector<8x32xf32>
    %301 = arith.mulf %294, %262 : vector<8x32xf32>
    %302 = arith.mulf %289, %295 : vector<8x32xf32>
    %303 = arith.addf %301, %302 : vector<8x32xf32>
    %304 = math.tanh %303 : vector<8x32xf32>
    %305 = arith.mulf %300, %304 : vector<8x32xf32>
    %306 = arith.index_cast %268 : i32 to index
    %c0_108 = arith.constant 0 : index
    %307 = vector.load %arg18[%306, %c0_108] : memref<64x32xf32, #tpu.memory_space<vmem>>, vector<8x32xf32>
    tpu.vector_store %arg18[%306, %c0_108], %305 {strides = array<i32>} : memref<64x32xf32, #tpu.memory_space<vmem>>, vector<8x32xf32>,
    %c7_i32 = arith.constant 7 : i32
    %c8_i32_109 = arith.constant 8 : i32
    %308 = arith.muli %c7_i32, %c8_i32_109 : i32
    %309 = tpu.assume_multiple %308, 8 : i32
    %310 = arith.index_cast %309 : i32 to index
    %c0_110 = arith.constant 0 : index
    %311 = vector.load %arg14[%310, %c0_110] : memref<64x32xf32, #tpu.memory_space<vmem>>, vector<8x32xf32>
    %cst_111 = arith.constant dense<0.000000e+00> : vector<8x32xf32>
    %312 = tpu.matmul %305, %15, %cst_111 {dimension_numbers = #tpu.dot_dimension_numbers<[1], [0], [0], [1], [0, 0, 1, 1], [], []>} : vector<8x32xf32>, vector<32x32xf32>, vector<8x32xf32> -> vector<8x32xf32>
    %313 = arith.addf %311, %312 : vector<8x32xf32>
    %314 = arith.index_cast %309 : i32 to index
    %c0_112 = arith.constant 0 : index
    %315 = vector.load %arg15[%314, %c0_112] : memref<64x32xf32, #tpu.memory_space<vmem>>, vector<8x32xf32>
    %cst_113 = arith.constant dense<0.000000e+00> : vector<8x32xf32>
    %316 = tpu.matmul %305, %16, %cst_113 {dimension_numbers = #tpu.dot_dimension_numbers<[1], [0], [0], [1], [0, 0, 1, 1], [], []>} : vector<8x32xf32>, vector<32x32xf32>, vector<8x32xf32> -> vector<8x32xf32>
    %317 = arith.addf %315, %316 : vector<8x32xf32>
    %318 = arith.index_cast %309 : i32 to index
    %c0_114 = arith.constant 0 : index
    %319 = vector.load %arg16[%318, %c0_114] : memref<64x32xf32, #tpu.memory_space<vmem>>, vector<8x32xf32>
    %cst_115 = arith.constant dense<0.000000e+00> : vector<8x32xf32>
    %320 = tpu.matmul %305, %17, %cst_115 {dimension_numbers = #tpu.dot_dimension_numbers<[1], [0], [0], [1], [0, 0, 1, 1], [], []>} : vector<8x32xf32>, vector<32x32xf32>, vector<8x32xf32> -> vector<8x32xf32>
    %321 = arith.addf %319, %320 : vector<8x32xf32>
    %322 = arith.index_cast %309 : i32 to index
    %c0_116 = arith.constant 0 : index
    %323 = vector.load %arg17[%322, %c0_116] : memref<64x32xf32, #tpu.memory_space<vmem>>, vector<8x32xf32>
    %cst_117 = arith.constant dense<0.000000e+00> : vector<8x32xf32>
    %324 = tpu.matmul %305, %18, %cst_117 {dimension_numbers = #tpu.dot_dimension_numbers<[1], [0], [0], [1], [0, 0, 1, 1], [], []>} : vector<8x32xf32>, vector<32x32xf32>, vector<8x32xf32> -> vector<8x32xf32>
    %325 = arith.addf %323, %324 : vector<8x32xf32>
    %326 = arith.negf %313 : vector<8x32xf32>
    %327 = math.exp %326 : vector<8x32xf32>
    %cst_118 = arith.constant 1.000000e+00 : f32
    %328 = vector.broadcast %cst_118 : f32 to vector<8x32xf32>
    %329 = arith.addf %328, %327 : vector<8x32xf32>
    %330 = arith.divf %328, %329 : vector<8x32xf32>
    %331 = arith.negf %317 : vector<8x32xf32>
    %332 = math.exp %331 : vector<8x32xf32>
    %cst_119 = arith.constant 1.000000e+00 : f32
    %333 = vector.broadcast %cst_119 : f32 to vector<8x32xf32>
    %334 = arith.addf %333, %332 : vector<8x32xf32>
    %335 = arith.divf %333, %334 : vector<8x32xf32>
    %336 = math.tanh %321 : vector<8x32xf32>
    %337 = arith.negf %325 : vector<8x32xf32>
    %338 = math.exp %337 : vector<8x32xf32>
    %cst_120 = arith.constant 1.000000e+00 : f32
    %339 = vector.broadcast %cst_120 : f32 to vector<8x32xf32>
    %340 = arith.addf %339, %338 : vector<8x32xf32>
    %341 = arith.divf %339, %340 : vector<8x32xf32>
    %342 = arith.mulf %335, %303 : vector<8x32xf32>
    %343 = arith.mulf %330, %336 : vector<8x32xf32>
    %344 = arith.addf %342, %343 : vector<8x32xf32>
    %345 = math.tanh %344 : vector<8x32xf32>
    %346 = arith.mulf %341, %345 : vector<8x32xf32>
    %347 = arith.index_cast %309 : i32 to index
    %c0_121 = arith.constant 0 : index
    %348 = vector.load %arg18[%347, %c0_121] : memref<64x32xf32, #tpu.memory_space<vmem>>, vector<8x32xf32>
    tpu.vector_store %arg18[%347, %c0_121], %346 {strides = array<i32>} : memref<64x32xf32, #tpu.memory_space<vmem>>, vector<8x32xf32>,
    %c8_i32_122 = arith.constant 8 : i32
    %c0_123 = arith.constant 0 : index
    %c0_124 = arith.constant 0 : index
    %349 = vector.load %arg12[%c0_123, %c0_124] : memref<8x32xf32, #tpu.memory_space<vmem>>, vector<8x32xf32>
    tpu.vector_store %arg12[%c0_123, %c0_124], %346 {strides = array<i32>} : memref<8x32xf32, #tpu.memory_space<vmem>>, vector<8x32xf32>,
    %c0_125 = arith.constant 0 : index
    %c0_126 = arith.constant 0 : index
    %350 = vector.load %arg13[%c0_125, %c0_126] : memref<8x32xf32, #tpu.memory_space<vmem>>, vector<8x32xf32>
    tpu.vector_store %arg13[%c0_125, %c0_126], %344 {strides = array<i32>} : memref<8x32xf32, #tpu.memory_space<vmem>>, vector<8x32xf32>,
    %c0_127 = arith.constant 0 : index
    %c0_128 = arith.constant 0 : index
    %351 = vector.load %arg18[%c0_127, %c0_128] : memref<64x32xf32, #tpu.memory_space<vmem>>, vector<64x32xf32>
    %c0_129 = arith.constant 0 : index
    %c0_130 = arith.constant 0 : index
    %352 = vector.load %arg7[%c0_129, %c0_130] : memref<32x32xf32, #tpu.memory_space<vmem>>, vector<32x32xf32>
    %cst_131 = arith.constant dense<0.000000e+00> : vector<64x32xf32>
    %353 = tpu.matmul %351, %352, %cst_131 {dimension_numbers = #tpu.dot_dimension_numbers<[1], [0], [0], [1], [0, 0, 1, 1], [], []>} : vector<64x32xf32>, vector<32x32xf32>, vector<64x32xf32> -> vector<64x32xf32>
    %c0_132 = arith.constant 0 : index
    %c0_133 = arith.constant 0 : index
    %354 = vector.load %arg8[%c0_132, %c0_133] : memref<1x32xf32, #tpu.memory_space<vmem>>, vector<1x32xf32>
    %355 = vector.broadcast %354 : vector<1x32xf32> to vector<64x32xf32>
    %356 = arith.addf %353, %355 : vector<64x32xf32>
    %cst_134 = arith.constant 0.000000e+00 : f32
    %357 = vector.broadcast %cst_134 : f32 to vector<64x32xf32>
    %358 = arith.maximumf %356, %357 : vector<64x32xf32>
    %c0_135 = arith.constant 0 : index
    %c0_136 = arith.constant 0 : index
    %359 = vector.load %arg9[%c0_135, %c0_136] : memref<32x4xf32, #tpu.memory_space<vmem>>, vector<32x4xf32>
    %cst_137 = arith.constant dense<0.000000e+00> : vector<64x4xf32>
    %360 = tpu.matmul %358, %359, %cst_137 {dimension_numbers = #tpu.dot_dimension_numbers<[1], [0], [0], [1], [0, 0, 1, 1], [], []>} : vector<64x32xf32>, vector<32x4xf32>, vector<64x4xf32> -> vector<64x4xf32>
    %c0_138 = arith.constant 0 : index
    %c0_139 = arith.constant 0 : index
    %361 = vector.load %arg10[%c0_138, %c0_139] : memref<1x4xf32, #tpu.memory_space<vmem>>, vector<1x4xf32>
    %362 = vector.broadcast %361 : vector<1x4xf32> to vector<64x4xf32>
    %363 = arith.addf %360, %362 : vector<64x4xf32>
    %c0_140 = arith.constant 0 : index
    %c0_141 = arith.constant 0 : index
    %364 = vector.load %arg11[%c0_140, %c0_141] : memref<64x4xf32, #tpu.memory_space<vmem>>, vector<64x4xf32>
    tpu.vector_store %arg11[%c0_140, %c0_141], %363 {strides = array<i32>} : memref<64x4xf32, #tpu.memory_space<vmem>>, vector<64x4xf32>,
    return
  }
  func.func @transform_0(%arg0: i32) -> (i32, i32) {
    %c0_i32 = arith.constant 0 : i32
    %c0_i32_0 = arith.constant 0 : i32
    %c0_i32_1 = arith.constant 0 : i32
    return %c0_i32, %c0_i32_0 : i32, i32
  }
  func.func @transform_1(%arg0: i32) -> (i32, i32) {
    %c0_i32 = arith.constant 0 : i32
    %c0_i32_0 = arith.constant 0 : i32
    %c0_i32_1 = arith.constant 0 : i32
    return %c0_i32, %c0_i32_0 : i32, i32
  }
  func.func @transform_2(%arg0: i32) -> (i32, i32) {
    %c0_i32 = arith.constant 0 : i32
    %c0_i32_0 = arith.constant 0 : i32
    %c0_i32_1 = arith.constant 0 : i32
    return %c0_i32, %c0_i32_0 : i32, i32
  }
  func.func @transform_3(%arg0: i32) -> (i32, i32) {
    %c0_i32 = arith.constant 0 : i32
    %c0_i32_0 = arith.constant 0 : i32
    %c0_i32_1 = arith.constant 0 : i32
    return %c0_i32, %c0_i32_0 : i32, i32
  }
  func.func @transform_4(%arg0: i32) -> (i32, i32) {
    %c0_i32 = arith.constant 0 : i32
    %c0_i32_0 = arith.constant 0 : i32
    %c0_i32_1 = arith.constant 0 : i32
    return %c0_i32, %c0_i32_0 : i32, i32
  }
  func.func @transform_5(%arg0: i32) -> (i32, i32) {
    %c0_i32 = arith.constant 0 : i32
    %c0_i32_0 = arith.constant 0 : i32
    %c0_i32_1 = arith.constant 0 : i32
    return %c0_i32, %c0_i32_0 : i32, i32
  }
  func.func @transform_6(%arg0: i32) -> (i32, i32) {
    %c0_i32 = arith.constant 0 : i32
    %c0_i32_0 = arith.constant 0 : i32
    %c0_i32_1 = arith.constant 0 : i32
    return %c0_i32, %c0_i32_0 : i32, i32
  }
  func.func @transform_7(%arg0: i32) -> (i32, i32) {
    %c0_i32 = arith.constant 0 : i32
    %c0_i32_0 = arith.constant 0 : i32
    %c0_i32_1 = arith.constant 0 : i32
    return %c0_i32, %c0_i32_0 : i32, i32
  }
  func.func @transform_8(%arg0: i32) -> (i32, i32) {
    %c0_i32 = arith.constant 0 : i32
    %c0_i32_0 = arith.constant 0 : i32
    %c0_i32_1 = arith.constant 0 : i32
    return %c0_i32, %c0_i32_0 : i32, i32
  }
  func.func @transform_9(%arg0: i32) -> (i32, i32) {
    %c0_i32 = arith.constant 0 : i32
    %c0_i32_0 = arith.constant 0 : i32
    %c0_i32_1 = arith.constant 0 : i32
    return %c0_i32, %c0_i32_0 : i32, i32
  }
  func.func @transform_10(%arg0: i32) -> (i32, i32) {
    %c0_i32 = arith.constant 0 : i32
    %c0_i32_0 = arith.constant 0 : i32
    %c0_i32_1 = arith.constant 0 : i32
    return %c0_i32, %c0_i32_0 : i32, i32
  }
  func.func @transform_11(%arg0: i32) -> (i32, i32) {
    %c0_i32 = arith.constant 0 : i32
    %c0_i32_0 = arith.constant 0 : i32
    %c0_i32_1 = arith.constant 0 : i32
    return %c0_i32, %c0_i32_0 : i32, i32
  }
  func.func @transform_12(%arg0: i32) -> (i32, i32) {
    %c0_i32 = arith.constant 0 : i32
    %c0_i32_0 = arith.constant 0 : i32
    %c0_i32_1 = arith.constant 0 : i32
    return %c0_i32, %c0_i32_0 : i32, i32
  }
}

</mosaic_0001>

<bundles_post_ra>
// kernel: tpu_custom_call.1
= control target key start
LH: loop header
LB: loop body
LE: loop exit
PB: predicated region body
PF: predicated region fallthrough
CT: control target
= control target key end

     0   :  { %18 = vsyncpa [#allocation8], 0  ;;  %vm57_vm0 = vcmask 130048   ;;  %s4116_s27 = smov 96   ;;  %v4117_v8 = vmov 0.0   ;;  %s4863_s0 = inlined_call_operand.vmem [shape: f32[64,16], index: 0, kind: input, shape index: {}]   ;;  %s4864_s1 = inlined_call_operand.vmem [shape: f32[8,32], index: 1, kind: input, shape index: {}]   ;;  %s4865_s2 = inlined_call_operand.vmem [shape: f32[8,32], index: 2, kind: input, shape index: {}]   ;;  %s4866_s3 = inlined_call_operand.vmem [shape: f32[16,128], index: 3, kind: input, shape index: {}]   ;;  %s4867_s4 = inlined_call_operand.vmem [shape: f32[32,128], index: 4, kind: input, shape index: {}]   ;;  %s4868_s5 = inlined_call_operand.vmem [shape: f32[1,128], index: 5, kind: input, shape index: {}]   ;;  %s4869_s6 = inlined_call_operand.vmem [shape: f32[32,32], index: 6, kind: input, shape index: {}]   ;;  %s4870_s7 = inlined_call_operand.vmem [shape: f32[1,32], index: 7, kind: input, shape index: {}]   ;;  %s4871_s8 = inlined_call_operand.vmem [shape: f32[32,4], index: 8, kind: input, shape index: {}]   ;;  %s4872_s9 = inlined_call_operand.vmem [shape: f32[1,4], index: 9, kind: input, shape index: {}]   ;;  %s4873_s10 = inlined_call_operand.vmem [shape: f32[64,4], index: 10, kind: output, shape index: {0}]   ;;  %s4874_s11 = inlined_call_operand.hbm [shape: f32[8,32], index: 11, kind: output, shape index: {1}]   ;;  %s4875_s12 = inlined_call_operand.hbm [shape: f32[8,32], index: 12, kind: output, shape index: {2}]  }
   0x1   :  { %v4191_v0 = vld [vmem:[%s4867_s4 + $0x8] sm:$0xff]  ;;  %v4196_v1 = vld [vmem:[%s4867_s4 + $0x18] sm:$0xff]  ;;  %v48_v3 = vld [vmem:[%s4866_s3] sm:$0xff]  ;;  %3541 = vmatprep.subr.mxu1 %v4117_v8 }
   0x2   :  { %v49_v2 = vld [vmem:[%s4866_s3 + $0x8] sm:$0xff]  ;;  %388 = vrot.lane.b32.xlu1 %v4191_v0, %s4116_s27  ;;  %392 = vrot.lane.b32.xlu0 %v4196_v1, %s4116_s27  ;;  %v40_v4 = vld [vmem:[%s4863_s0] sm:$0xff] }
   0x3   :  { %3525 = vmatprep.subr.mxu0 %v49_v2  ;;  %3529 = vmatprep.mubr.msk.f32.mxu0 %vm57_vm0, %v40_v4  ;;  %v4215_v5 = vld [vmem:[%s4867_s4] sm:$0xff]  ;;  %v4220_v6 = vld [vmem:[%s4867_s4 + $0x10] sm:$0xff]  ;;  %v41_v7 = vld [vmem:[%s4863_s0 + $0x8] sm:$0xff] }
   0x4   :  { %3526 = vmatpush3.msra.mxu0 %v49_v2  ;;  %3542 = vmatpush3.msra.mxu1 %v4196_v1  ;;  %v42_v9 = vld [vmem:[%s4863_s0 + $0x10] sm:$0xff] }
   0x5   :  { %3527 = vmatprep.subr.mxu0 %v48_v3 }
   0x6   :  { %3528 = vmatpush3.msra.mxu0 %v48_v3  ;;  %386 = vrot.lane.b32.xlu1 %v4215_v5, %s4116_s27 }
   0x7   :  { %19 = vsyncpa [#allocation10], 0  ;;  %390 = vrot.lane.b32.xlu0 %v4220_v6, %s4116_s27  ;;  %3530 = vmatmul.mubr.msk.f32.vlgmr.msra.gmra.mxu0 %vm57_vm0, %v41_v7  ;;  %vm4118_vm1 = vmmov 0   ;;  %v43_v10 = vld [vmem:[%s4863_s0 + $0x18] sm:$0xff]  ;;  %s4119_s23 = smov 32   ;;  %v44_v11 = vld [vmem:[%s4863_s0 + $0x20] sm:$0xff] }
   0x8   :  { %3543 = vmatprep.subr.mxu1 %v4117_v8  ;;  %3549 = vmatprep.mubr.msk.f32.mxu1 %vm4118_vm1, %v4117_v8  ;;  %s4120_s26 = smov 64   ;;  %vm187_vm2 = vcmask 261120   ;;  %v304_v12 = vld [vmem:[%s4864_s1] sm:$0xff]  ;;  %v45_v13 = vld [vmem:[%s4863_s0 + $0x28] sm:$0xff]  ;;  %v46_v14 = vld [vmem:[%s4863_s0 + $0x30] sm:$0xff]  ;;  %vm3207_vm3 = vcmask 31744  }
   0x9   :  { %3544 = vmatpush3.msra.mxu1 %v4220_v6  ;;  %3532 = vmatprep.mubr.msk.f32.mxu0 %vm57_vm0, %v42_v9  ;;  %v47_v15 = vld [vmem:[%s4863_s0 + $0x38] sm:$0xff]  ;;  %v3248_v28 = vld [vmem:[%s4868_s5] ss:$0 sm:$0xff]  ;;  %s4121_s28 = smov [#allocation7]   ;;  %s4122_s30 = smov [#allocation9]  }
   0xa   :  { %560 = vrot.lane.b32.xlu1 %v4196_v1, %s4119_s23  ;;  %3545 = vmatprep.subr.mxu1 %v4117_v8  ;;  %s3224_s29 = sshll.u32 %s4121_s28, 4  ;;  %s3234_s13 = sshll.u32 %s4122_s30, 4  ;;  %s3225_s29 = int_to_ptr.vmem [resolvable:$true] %s3224_s29  ;;  %s3235_s13 = int_to_ptr.vmem [resolvable:$true] %s3234_s13 }
   0xb   :  { %476 = vrot.lane.b32.xlu0 %v4196_v1, %s4120_s26  ;;  %3546 = vmatpush3.msra.mxu1 %v4191_v0  ;;  %p4077_p1 = scmp.lt.s32.totalorder %s3225_s29, %s3225_s29 }
   0xc   :  { %3547 = vmatprep.subr.mxu1 %v4117_v8  ;;  %3533 = vmatmul.mubr.msk.f32.gmra.mxu0 %vm57_vm0, %v43_v10 }
   0xd   :  { %3548 = vmatpush3.msra.mxu1 %v4215_v5  ;;  %3535 = vmatprep.mubr.msk.f32.mxu0 %vm57_vm0, %v44_v11 }
   0xe   :  { %558 = vrot.lane.b32.xlu1 %v4220_v6, %s4119_s23  ;;  %3550 = vmatmul.mubr.msk.f32.vlgmr.msra.gmra.mxu1 %vm187_vm2, %v304_v12 }
   0xf   :  { %474 = vrot.lane.b32.xlu0 %v4220_v6, %s4120_s26  ;;  %3552 = vmatprep.subr.mxu1 %v4117_v8 }
  0x10   :  { %3536 = vmatmul.mubr.msk.f32.gmra.mxu0 %vm57_vm0, %v45_v13  ;;  %3560 = vmatprep.mubr.msk.f32.mxu1 %vm4118_vm1, %v4117_v8 }
  0x11   :  { %3563 = vmatprep.subr.mxu0 %v4117_v8  ;;  %3538 = vmatprep.mubr.msk.f32.mxu0 %vm57_vm0, %v46_v14 }
  0x12   :  { %556 = vrot.lane.b32.xlu1 %v4191_v0, %s4119_s23 }
  0x13   :  { %472 = vrot.lane.b32.xlu0 %v4191_v0, %s4120_s26 }
  0x14   :  { %3539 = vmatmul.mubr.msk.f32.gmra.mxu0 %vm57_vm0, %v47_v15 }
  0x15   :  { %3571 = vmatprep.mubr.msk.f32.mxu0 %vm4118_vm1, %v4117_v8 }
  0x16   :  { %554 = vrot.lane.b32.xlu1 %v4215_v5, %s4119_s23 }
  0x17   :  { %470 = vrot.lane.b32.xlu0 %v4215_v5, %s4120_s26 }
  0x74   :  { %v4290_v16 = vpop.permute.xlu1 %388  ;;  %v4292_v17 = vpop.permute.xlu0 %392 }
  0x75   :  { %3553 = vmatpush3.msra.mxu1 %v4292_v17 }
  0x76   :  { %3554 = vmatprep.subr.mxu1 %v4117_v8 }
  0x78   :  { %v4296_v18 = vpop.permute.xlu1 %386 }
  0x79   :  { %v4298_v19 = vpop.permute.xlu0 %390 }
  0x7a   :  { %3555 = vmatpush3.msra.mxu1 %v4298_v19 }
  0x7b   :  { %3556 = vmatprep.subr.mxu1 %v4117_v8 }
  0x7c   :  { %v4302_v20 = vpop.permute.xlu1 %560  ;;  %3557 = vmatpush3.msra.mxu1 %v4290_v16 }
  0x7d   :  { %v4305_v21 = vpop.permute.xlu0 %476  ;;  %3558 = vmatprep.subr.mxu1 %v4117_v8 }
  0x7e   :  { %3559 = vmatpush3.msra.mxu1 %v4296_v18  ;;  %3564 = vmatpush3.msra.mxu0 %v4305_v21 }
  0x7f   :  { %3574 = vmatprep.subr.mxu1 %v4117_v8  ;;  %3561 = vmatmul.mubr.msk.f32.vlgmr.msra.gmra.mxu1 %vm187_vm2, %v304_v12 }
  0x80   :  { %v4312_v22 = vpop.permute.xlu1 %558  ;;  %3575 = vmatpush3.msra.mxu1 %v4302_v20  ;;  %3565 = vmatprep.subr.mxu0 %v4117_v8 }
  0x81   :  { %v4316_v23 = vpop.permute.xlu0 %474  ;;  %3576 = vmatprep.subr.mxu1 %v4117_v8  ;;  %3582 = vmatprep.mubr.msk.f32.mxu1 %vm4118_vm1, %v4117_v8 }
  0x82   :  { %3566 = vmatpush3.msra.mxu0 %v4316_v23  ;;  %3577 = vmatpush3.msra.mxu1 %v4312_v22 }
  0x83   :  { %3567 = vmatprep.subr.mxu0 %v4117_v8  ;;  %3578 = vmatprep.subr.mxu1 %v4117_v8 }
  0x84   :  { %v4325_v24 = vpop.permute.xlu1 %556 }
  0x85   :  { %v4327_v25 = vpop.permute.xlu0 %472  ;;  %3579 = vmatpush3.msra.mxu1 %v4325_v24 }
  0x86   :  { %3568 = vmatpush3.msra.mxu0 %v4327_v25  ;;  %3580 = vmatprep.subr.mxu1 %v4117_v8 }
  0x87   :  { %3569 = vmatprep.subr.mxu0 %v4117_v8 }
  0x88   :  { %v4333_v26 = vpop.permute.xlu1 %554 }
  0x89   :  { %v4335_v27 = vpop.permute.xlu0 %470  ;;  %3581 = vmatpush3.msra.mxu1 %v4333_v26 }
  0x8a   :  { %3570 = vmatpush3.msra.mxu0 %v4335_v27  ;;  %3583 = vmatmul.mubr.msk.f32.vlgmr.msra.gmra.mxu1 %vm187_vm2, %v304_v12 }
  0x8b   :  { %3572 = vmatmul.mubr.msk.f32.vlgmr.msra.gmra.mxu0 %vm187_vm2, %v304_v12  ;;  %3596 = vmatprep.subr.mxu1 %v4117_v8 }
  0x8c   :  { %3597 = vmatpush3.msra.mxu1 %v4292_v17  ;;  %3585 = vmatprep.subr.mxu0 %v4117_v8 }
  0x8d   :  { %3598 = vmatprep.subr.mxu1 %v4117_v8  ;;  %3586 = vmatpush3.msra.mxu0 %v4196_v1 }
  0x8e   :  { %3599 = vmatpush3.msra.mxu1 %v4298_v19  ;;  %3587 = vmatprep.subr.mxu0 %v4117_v8 }
  0x8f   :  { %3600 = vmatprep.subr.mxu1 %v4117_v8  ;;  %3588 = vmatpush3.msra.mxu0 %v4220_v6 }
  0x90   :  { %3601 = vmatpush3.msra.mxu1 %v4290_v16  ;;  %3589 = vmatprep.subr.mxu0 %v4117_v8 }
  0x91   :  { %3602 = vmatprep.subr.mxu1 %v4117_v8  ;;  %3590 = vmatpush3.msra.mxu0 %v4191_v0 }
  0x92   :  { %3603 = vmatpush3.msra.mxu1 %v4296_v18  ;;  %3591 = vmatprep.subr.mxu0 %v4117_v8 }
  0x93   :  { %3592 = vmatpush3.msra.mxu0 %v4215_v5  ;;  %3593 = vmatprep.mubr.msk.f32.mxu0 %vm4118_vm1, %v4117_v8 }
  0x94   :  { %3604 = vmatprep.mubr.msk.f32.mxu1 %vm4118_vm1, %v4117_v8  ;;  %3607 = vmatprep.subr.mxu0 %v4117_v8 }
  0x95   :  { %3618 = vmatprep.subr.mxu1 %v4117_v8 }
  0xc7   :  { %v3531_v29 = vpop.f32.mrf.mxu0 }
  0xc8   :  { %v154_v30 = vadd.f32 %v3531_v29, %v3248_v28 }
  0xc9   :  { %v148_v31 = vpop.f32.mrf.mxu0 }
  0xca   :  { %189 = vst.msk [vmem:[#allocation2 + $0x8] sm:$0xff] %vm187_vm2, %v154_v30  ;;  %v149_v32 = vadd.f32 %v3248_v28, %v148_v31 }
  0xcc   :  { %188 = vst.msk [vmem:[#allocation2] sm:$0xff] %vm187_vm2, %v149_v32  ;;  %236 = vrot.lane.b32.xlu1 %v149_v32, %s4120_s26  ;;  %204 = vrot.lane.b32.xlu0 %v149_v32, %s4116_s27  ;;  %v3534_v33 = vpop.f32.mrf.mxu0 }
  0xcd   :  { %v164_v34 = vadd.f32 %v3534_v33, %v3248_v28 }
  0xce   :  { %v376_v35 = vpop.f32.mrf.mxu1  ;;  %v158_v36 = vpop.f32.mrf.mxu0 }
  0xcf   :  { %191 = vst.msk [vmem:[#allocation2 + $0x18] sm:$0xff] %vm187_vm2, %v164_v34  ;;  %v159_v37 = vadd.f32 %v3248_v28, %v158_v36 }
  0xd0   :  { %206 = vrot.lane.b32.xlu1 %v154_v30, %s4116_s27  ;;  %268 = vrot.lane.b32.xlu0 %v149_v32, %s4119_s23  ;;  %v3537_v38 = vpop.f32.mrf.mxu0  ;;  %v3551_v39 = vpop.f32.mrf.mxu1 }
  0xd1   :  { %190 = vst.msk [vmem:[#allocation2 + $0x10] sm:$0xff] %vm187_vm2, %v159_v37  ;;  %v174_v40 = vadd.f32 %v3537_v38, %v3248_v28 }
  0xd2   :  { %v168_v41 = vpop.f32.mrf.mxu0 }
  0xd3   :  { %193 = vst.msk [vmem:[#allocation2 + $0x28] sm:$0xff] %vm187_vm2, %v174_v40  ;;  %v169_v42 = vadd.f32 %v3248_v28, %v168_v41  ;;  %v306_v47 = vld [vmem:[#allocation2] sm:$0xff] }
  0xd4   :  { %270 = vrot.lane.b32.xlu1 %v154_v30, %s4119_s23  ;;  %238 = vrot.lane.b32.xlu0 %v154_v30, %s4120_s26  ;;  %v3540_v43 = vpop.f32.mrf.mxu0  ;;  %v380_v48 = vadd.f32 %v376_v35, %v306_v47 }
  0xd5   :  { %192 = vst.msk [vmem:[#allocation2 + $0x20] sm:$0xff] %vm187_vm2, %v169_v42  ;;  %v184_v44 = vadd.f32 %v3540_v43, %v3248_v28  ;;  %v305_v43 = vld [vmem:[%s4865_s2] sm:$0xff] }
  0xd6   :  { %v178_v45 = vpop.f32.mrf.mxu0  ;;  %v3261_v53 = vmul.f32 -1.442695, %v380_v48 }
  0xd7   :  { %195 = vst.msk [vmem:[#allocation2 + $0x38] sm:$0xff] %vm187_vm2, %v184_v44  ;;  %v179_v46 = vadd.f32 %v3248_v28, %v178_v45 }
  0xd8   :  { %240 = vrot.lane.b32.xlu1 %v159_v37, %s4120_s26  ;;  %208 = vrot.lane.b32.xlu0 %v159_v37, %s4116_s27  ;;  %3940 = vpow2.f32 %v3261_v53 }
  0xd9   :  { %194 = vst.msk [vmem:[#allocation2 + $0x30] sm:$0xff] %vm187_vm2, %v179_v46 }
  0xdc   :  { %210 = vrot.lane.b32.xlu1 %v164_v34, %s4116_s27  ;;  %272 = vrot.lane.b32.xlu0 %v159_v37, %s4119_s23 }
  0xe0   :  { %274 = vrot.lane.b32.xlu1 %v164_v34, %s4119_s23  ;;  %242 = vrot.lane.b32.xlu0 %v164_v34, %s4120_s26 }
  0xe4   :  { %244 = vrot.lane.b32.xlu1 %v169_v42, %s4120_s26  ;;  %212 = vrot.lane.b32.xlu0 %v169_v42, %s4116_s27 }
  0xe5   :  { %v3941_v13 = vpop.eup %3940 }
  0xe6   :  { %v640_v30 = vadd.f32 1.0, %v3941_v13 }
  0xe8   :  { %214 = vrot.lane.b32.xlu1 %v174_v40, %s4116_s27  ;;  %276 = vrot.lane.b32.xlu0 %v169_v42, %s4119_s23 }
  0xec   :  { %278 = vrot.lane.b32.xlu1 %v174_v40, %s4119_s23  ;;  %246 = vrot.lane.b32.xlu0 %v174_v40, %s4120_s26 }
  0xf0   :  { %248 = vrot.lane.b32.xlu1 %v179_v46, %s4120_s26  ;;  %216 = vrot.lane.b32.xlu0 %v179_v46, %s4116_s27 }
  0xf4   :  { %218 = vrot.lane.b32.xlu1 %v184_v44, %s4116_s27  ;;  %280 = vrot.lane.b32.xlu0 %v179_v46, %s4119_s23 }
  0xf8   :  { %282 = vrot.lane.b32.xlu1 %v184_v44, %s4119_s23  ;;  %250 = vrot.lane.b32.xlu0 %v184_v44, %s4120_s26 }
 0x13e   :  { %v237_v49 = vpop.permute.xlu1 %236  ;;  %v205_v50 = vpop.permute.xlu0 %204 }
 0x13f   :  { %260 = vst.msk [vmem:[#allocation4] sm:$0xff] %vm187_vm2, %v237_v49  ;;  %228 = vst.msk [vmem:[#allocation3] sm:$0xff] %vm187_vm2, %v205_v50  ;;  %v464_v51 = vpop.f32.mrf.mxu1 }
 0x141   :  { %v3562_v52 = vpop.f32.mrf.mxu1 }
 0x142   :  { %v207_v54 = vpop.permute.xlu1 %206  ;;  %v269_v55 = vpop.permute.xlu0 %268 }
 0x143   :  { %229 = vst.msk [vmem:[#allocation3 + $0x8] sm:$0xff] %vm187_vm2, %v207_v54  ;;  %292 = vst.msk [vmem:[#allocation5] sm:$0xff] %vm187_vm2, %v269_v55 }
 0x146   :  { %v381_v56 = vld [vmem:[#allocation3] sm:$0xff]  ;;  %v271_v57 = vpop.permute.xlu1 %270  ;;  %v239_v58 = vpop.permute.xlu0 %238 }
 0x147   :  { %v468_v59 = vadd.f32 %v464_v51, %v381_v56  ;;  %293 = vst.msk [vmem:[#allocation5 + $0x8] sm:$0xff] %vm187_vm2, %v271_v57  ;;  %261 = vst.msk [vmem:[#allocation4 + $0x8] sm:$0xff] %vm187_vm2, %v239_v58  ;;  %v469_v15 = vld [vmem:[#allocation4] sm:$0xff]  ;;  %v663_v57 = vld [vmem:[#allocation2 + $0x8] sm:$0xff] }
 0x149   :  { %v3262_v60 = vmul.f32 -1.442695, %v468_v59 }
 0x14a   :  { %v632_v61 = vpop.f32.mrf.mxu1  ;;  %v241_v62 = vpop.permute.xlu1 %240  ;;  %v553_v4 = vld [vmem:[#allocation5] sm:$0xff]  ;;  %v739_v59 = vld [vmem:[#allocation3 + $0x8] sm:$0xff] }
 0x14b   :  { %3942 = vpow2.f32 %v3262_v60  ;;  %v548_v63 = vpop.f32.mrf.mxu0  ;;  %262 = vst.msk [vmem:[#allocation4 + $0x10] sm:$0xff] %vm187_vm2, %v241_v62  ;;  %v209_v2 = vpop.permute.xlu0 %208  ;;  %v636_v11 = vadd.f32 %v632_v61, %v553_v4 }
 0x14c   :  { %v3584_v3 = vpop.f32.mrf.mxu1  ;;  %230 = vst.msk [vmem:[#allocation3 + $0x10] sm:$0xff] %vm187_vm2, %v209_v2  ;;  %v552_v29 = vadd.f32 %v548_v63, %v469_v15 }
 0x14d   :  { %v3573_v7 = vpop.f32.mrf.mxu0  ;;  %v3263_v28 = vmul.f32 -1.442695, %v636_v11 }
 0x14e   :  { %v211_v9 = vpop.permute.xlu1 %210 }
 0x14f   :  { %231 = vst.msk [vmem:[#allocation3 + $0x18] sm:$0xff] %vm187_vm2, %v211_v9  ;;  %v273_v10 = vpop.permute.xlu0 %272  ;;  %3944 = vpow2.f32 %v3263_v28 }
 0x150   :  { %294 = vst.msk [vmem:[#allocation5 + $0x10] sm:$0xff] %vm187_vm2, %v273_v10  ;;  %3946 = vtanh.f32 %v552_v29  ;;  %v885_v10 = vld [vmem:[#allocation5 + $0x8] sm:$0xff] }
 0x151   :  { %3948 = vrcp.f32 %v640_v30 }
 0x152   :  { %v275_v12 = vpop.permute.xlu1 %274 }
 0x153   :  { %295 = vst.msk [vmem:[#allocation5 + $0x18] sm:$0xff] %vm187_vm2, %v275_v12  ;;  %v243_v14 = vpop.permute.xlu0 %242 }
 0x154   :  { %263 = vst.msk [vmem:[#allocation4 + $0x18] sm:$0xff] %vm187_vm2, %v243_v14  ;;  %v812_v14 = vld [vmem:[#allocation4 + $0x8] sm:$0xff] }
 0x156   :  { %v245_v31 = vpop.permute.xlu1 %244 }
 0x157   :  { %264 = vst.msk [vmem:[#allocation4 + $0x20] sm:$0xff] %vm187_vm2, %v245_v31  ;;  %v213_v32 = vpop.permute.xlu0 %212 }
 0x158   :  { %v3943_v33 = vpop.eup %3942  ;;  %232 = vst.msk [vmem:[#allocation3 + $0x20] sm:$0xff] %vm187_vm2, %v213_v32 }
 0x159   :  { %v646_v34 = vadd.f32 1.0, %v3943_v33 }
 0x15a   :  { %v215_v35 = vpop.permute.xlu1 %214 }
 0x15b   :  { %3950 = vrcp.f32 %v646_v34  ;;  %233 = vst.msk [vmem:[#allocation3 + $0x28] sm:$0xff] %vm187_vm2, %v215_v35  ;;  %v277_v36 = vpop.permute.xlu0 %276 }
 0x15c   :  { %296 = vst.msk [vmem:[#allocation5 + $0x20] sm:$0xff] %vm187_vm2, %v277_v36  ;;  %v3945_v41 = vpop.eup %3944 }
 0x15d   :  { %v3947_v42 = vpop.eup %3946  ;;  %v653_v48 = vadd.f32 1.0, %v3945_v41 }
 0x15e   :  { %v279_v37 = vpop.permute.xlu1 %278  ;;  %v3949_v45 = vpop.eup %3948 }
 0x15f   :  { %297 = vst.msk [vmem:[#allocation5 + $0x28] sm:$0xff] %vm187_vm2, %v279_v37  ;;  %v247_v38 = vpop.permute.xlu0 %246  ;;  %v657_v50 = vmul.f32 %v3949_v45, %v3947_v42  ;;  %3952 = vrcp.f32 %v653_v48 }
 0x160   :  { %265 = vst.msk [vmem:[#allocation4 + $0x28] sm:$0xff] %vm187_vm2, %v247_v38 }
 0x162   :  { %v249_v39 = vpop.permute.xlu1 %248 }
 0x163   :  { %266 = vst.msk [vmem:[#allocation4 + $0x30] sm:$0xff] %vm187_vm2, %v249_v39  ;;  %v217_v40 = vpop.permute.xlu0 %216 }
 0x164   :  { %234 = vst.msk [vmem:[#allocation3 + $0x30] sm:$0xff] %vm187_vm2, %v217_v40 }
 0x166   :  { %v219_v44 = vpop.permute.xlu1 %218 }
 0x167   :  { %235 = vst.msk [vmem:[#allocation3 + $0x38] sm:$0xff] %vm187_vm2, %v219_v44  ;;  %v281_v46 = vpop.permute.xlu0 %280  ;;  %v984_v44 = vld [vmem:[#allocation2 + $0x10] sm:$0xff] }
 0x168   :  { %v3951_v47 = vpop.eup %3950  ;;  %298 = vst.msk [vmem:[#allocation5 + $0x30] sm:$0xff] %vm187_vm2, %v281_v46  ;;  %v1060_v46 = vld [vmem:[#allocation3 + $0x10] sm:$0xff] }
 0x169   :  { %v656_v49 = vmul.f32 %v3951_v47, %v305_v43 }
 0x16a   :  { %v283_v51 = vpop.permute.xlu1 %282 }
 0x16b   :  { %v4423_v52 = vadd.f32 %v657_v50, %v656_v49  ;;  %299 = vst.msk [vmem:[#allocation5 + $0x38] sm:$0xff] %vm187_vm2, %v283_v51  ;;  %v251_v53 = vpop.permute.xlu0 %250 }
 0x16c   :  { %267 = vst.msk [vmem:[#allocation4 + $0x38] sm:$0xff] %vm187_vm2, %v251_v53  ;;  %v3953_v54 = vpop.eup %3952 }
 0x16d   :  { %3954 = vtanh.f32 %v4423_v52 }
 0x17a   :  { %v3955_v55 = vpop.eup %3954 }
 0x17b   :  { %v660_v56 = vmul.f32 %v3955_v55, %v3953_v54 }
 0x17d   :  { %661 = vst.msk [vmem:[#allocation6] sm:$0xff] %vm187_vm2, %v660_v56  ;;  %3594 = vmatmul.mubr.msk.f32.vlgmr.msra.gmra.mxu0 %vm187_vm2, %v660_v56  ;;  %3605 = vmatmul.mubr.msk.f32.vlgmr.msra.gmra.mxu1 %vm187_vm2, %v660_v56 }
 0x17e   :  { %3608 = vmatpush3.msra.mxu0 %v4305_v21  ;;  %3619 = vmatpush3.msra.mxu1 %v4302_v20 }
 0x17f   :  { %3609 = vmatprep.subr.mxu0 %v4117_v8  ;;  %3620 = vmatprep.subr.mxu1 %v4117_v8 }
 0x180   :  { %3610 = vmatpush3.msra.mxu0 %v4316_v23  ;;  %3621 = vmatpush3.msra.mxu1 %v4312_v22 }
 0x181   :  { %3611 = vmatprep.subr.mxu0 %v4117_v8  ;;  %3622 = vmatprep.subr.mxu1 %v4117_v8 }
 0x182   :  { %3612 = vmatpush3.msra.mxu0 %v4327_v25  ;;  %3623 = vmatpush3.msra.mxu1 %v4325_v24 }
 0x183   :  { %3613 = vmatprep.subr.mxu0 %v4117_v8  ;;  %3624 = vmatprep.subr.mxu1 %v4117_v8 }
 0x184   :  { %3614 = vmatpush3.msra.mxu0 %v4335_v27  ;;  %3615 = vmatprep.mubr.msk.f32.mxu0 %vm4118_vm1, %v4117_v8 }
 0x185   :  { %3625 = vmatpush3.msra.mxu1 %v4333_v26  ;;  %3626 = vmatprep.mubr.msk.f32.mxu1 %vm4118_vm1, %v4117_v8 }
 0x186   :  { %3616 = vmatmul.mubr.msk.f32.vlgmr.msra.gmra.mxu0 %vm187_vm2, %v660_v56  ;;  %3627 = vmatmul.mubr.msk.f32.vlgmr.msra.gmra.mxu1 %vm187_vm2, %v660_v56  ;;  %v1206_v56 = vld [vmem:[#allocation5 + $0x10] sm:$0xff] }
 0x187   :  { %3640 = vmatprep.subr.mxu1 %v4117_v8  ;;  %3629 = vmatprep.subr.mxu0 %v4117_v8 }
 0x188   :  { %3641 = vmatpush3.msra.mxu1 %v4292_v17  ;;  %3630 = vmatpush3.msra.mxu0 %v4196_v1 }
 0x189   :  { %3642 = vmatprep.subr.mxu1 %v4117_v8  ;;  %3631 = vmatprep.subr.mxu0 %v4117_v8 }
 0x18a   :  { %3643 = vmatpush3.msra.mxu1 %v4298_v19  ;;  %3632 = vmatpush3.msra.mxu0 %v4220_v6 }
 0x18b   :  { %3644 = vmatprep.subr.mxu1 %v4117_v8  ;;  %3633 = vmatprep.subr.mxu0 %v4117_v8 }
 0x18c   :  { %3645 = vmatpush3.msra.mxu1 %v4290_v16  ;;  %3634 = vmatpush3.msra.mxu0 %v4191_v0 }
 0x18d   :  { %3646 = vmatprep.subr.mxu1 %v4117_v8  ;;  %3635 = vmatprep.subr.mxu0 %v4117_v8 }
 0x18e   :  { %3647 = vmatpush3.msra.mxu1 %v4296_v18  ;;  %3636 = vmatpush3.msra.mxu0 %v4215_v5 }
 0x18f   :  { %3637 = vmatprep.mubr.msk.f32.mxu0 %vm4118_vm1, %v4117_v8  ;;  %3648 = vmatprep.mubr.msk.f32.mxu1 %vm4118_vm1, %v4117_v8 }
 0x190   :  { %3651 = vmatprep.subr.mxu0 %v4117_v8  ;;  %3662 = vmatprep.subr.mxu1 %v4117_v8 }
 0x23d   :  { %v733_v58 = vpop.f32.mrf.mxu0  ;;  %v806_v60 = vpop.f32.mrf.mxu1 }
 0x23e   :  { %v737_v61 = vadd.f32 %v733_v58, %v663_v57  ;;  %v810_v62 = vadd.f32 %v806_v60, %v739_v59  ;;  %v1133_v60 = vld [vmem:[#allocation4 + $0x10] sm:$0xff] }
 0x23f   :  { %v3595_v63 = vpop.f32.mrf.mxu0  ;;  %v3606_v2 = vpop.f32.mrf.mxu1 }
 0x240   :  { %v3268_v3 = vmul.f32 -1.442695, %v737_v61  ;;  %v3269_v4 = vmul.f32 -1.442695, %v810_v62 }
 0x242   :  { %3956 = vpow2.f32 %v3268_v3 }
 0x243   :  { %3958 = vpow2.f32 %v3269_v4 }
 0x246   :  { %v879_v7 = vpop.f32.mrf.mxu0  ;;  %v952_v9 = vpop.f32.mrf.mxu1 }
 0x247   :  { %v956_v11 = vadd.f32 %v952_v9, %v885_v10  ;;  %v883_v28 = vadd.f32 %v879_v7, %v812_v14 }
 0x248   :  { %v3617_v12 = vpop.f32.mrf.mxu0  ;;  %v3628_v13 = vpop.f32.mrf.mxu1 }
 0x249   :  { %v3270_v15 = vmul.f32 -1.442695, %v956_v11 }
 0x24b   :  { %3960 = vpow2.f32 %v3270_v15 }
 0x24c   :  { %3962 = vtanh.f32 %v883_v28 }
 0x24f   :  { %v3957_v29 = vpop.eup %3956 }
 0x250   :  { %v3959_v30 = vpop.eup %3958  ;;  %v960_v31 = vadd.f32 1.0, %v3957_v29 }
 0x251   :  { %v966_v32 = vadd.f32 1.0, %v3959_v30 }
 0x252   :  { %3964 = vrcp.f32 %v960_v31 }
 0x253   :  { %3966 = vrcp.f32 %v966_v32 }
 0x258   :  { %v3961_v33 = vpop.eup %3960 }
 0x259   :  { %v3963_v34 = vpop.eup %3962  ;;  %v973_v38 = vadd.f32 1.0, %v3961_v33 }
 0x25b   :  { %3968 = vrcp.f32 %v973_v38 }
 0x25f   :  { %v3965_v35 = vpop.eup %3964 }
 0x260   :  { %v3967_v36 = vpop.eup %3966  ;;  %v977_v37 = vmul.f32 %v3965_v35, %v3963_v34 }
 0x261   :  { %v976_v39 = vmul.f32 %v3967_v36, %v4423_v52 }
 0x263   :  { %v4474_v40 = vadd.f32 %v977_v37, %v976_v39  ;;  %v1527_v39 = vld [vmem:[#allocation5 + $0x18] sm:$0xff] }
 0x265   :  { %3970 = vtanh.f32 %v4474_v40 }
 0x268   :  { %v3969_v41 = vpop.eup %3968 }
 0x272   :  { %v3971_v42 = vpop.eup %3970 }
 0x273   :  { %v980_v43 = vmul.f32 %v3971_v42, %v3969_v41 }
 0x275   :  { %982 = vst.msk [vmem:[#allocation6 + $0x8] sm:$0xff] %vm187_vm2, %v980_v43  ;;  %3638 = vmatmul.mubr.msk.f32.vlgmr.msra.gmra.mxu0 %vm187_vm2, %v980_v43  ;;  %3649 = vmatmul.mubr.msk.f32.vlgmr.msra.gmra.mxu1 %vm187_vm2, %v980_v43 }
 0x276   :  { %3652 = vmatpush3.msra.mxu0 %v4305_v21  ;;  %3663 = vmatpush3.msra.mxu1 %v4302_v20 }
 0x277   :  { %3653 = vmatprep.subr.mxu0 %v4117_v8  ;;  %3664 = vmatprep.subr.mxu1 %v4117_v8 }
 0x278   :  { %3654 = vmatpush3.msra.mxu0 %v4316_v23  ;;  %3665 = vmatpush3.msra.mxu1 %v4312_v22 }
 0x279   :  { %3655 = vmatprep.subr.mxu0 %v4117_v8  ;;  %3666 = vmatprep.subr.mxu1 %v4117_v8 }
 0x27a   :  { %3656 = vmatpush3.msra.mxu0 %v4327_v25  ;;  %3667 = vmatpush3.msra.mxu1 %v4325_v24 }
 0x27b   :  { %3657 = vmatprep.subr.mxu0 %v4117_v8  ;;  %3668 = vmatprep.subr.mxu1 %v4117_v8 }
 0x27c   :  { %3658 = vmatpush3.msra.mxu0 %v4335_v27  ;;  %3659 = vmatprep.mubr.msk.f32.mxu0 %vm4118_vm1, %v4117_v8 }
 0x27d   :  { %3669 = vmatpush3.msra.mxu1 %v4333_v26  ;;  %3670 = vmatprep.mubr.msk.f32.mxu1 %vm4118_vm1, %v4117_v8 }
 0x27e   :  { %3660 = vmatmul.mubr.msk.f32.vlgmr.msra.gmra.mxu0 %vm187_vm2, %v980_v43  ;;  %3671 = vmatmul.mubr.msk.f32.vlgmr.msra.gmra.mxu1 %vm187_vm2, %v980_v43  ;;  %v1454_v43 = vld [vmem:[#allocation4 + $0x18] sm:$0xff] }
 0x27f   :  { %3684 = vmatprep.subr.mxu1 %v4117_v8  ;;  %3673 = vmatprep.subr.mxu0 %v4117_v8 }
 0x280   :  { %3685 = vmatpush3.msra.mxu1 %v4292_v17  ;;  %3674 = vmatpush3.msra.mxu0 %v4196_v1 }
 0x281   :  { %3686 = vmatprep.subr.mxu1 %v4117_v8  ;;  %3675 = vmatprep.subr.mxu0 %v4117_v8 }
 0x282   :  { %3687 = vmatpush3.msra.mxu1 %v4298_v19  ;;  %3676 = vmatpush3.msra.mxu0 %v4220_v6 }
 0x283   :  { %3688 = vmatprep.subr.mxu1 %v4117_v8  ;;  %3677 = vmatprep.subr.mxu0 %v4117_v8 }
 0x284   :  { %3689 = vmatpush3.msra.mxu1 %v4290_v16  ;;  %3678 = vmatpush3.msra.mxu0 %v4191_v0 }
 0x285   :  { %3690 = vmatprep.subr.mxu1 %v4117_v8  ;;  %3679 = vmatprep.subr.mxu0 %v4117_v8 }
 0x286   :  { %3691 = vmatpush3.msra.mxu1 %v4296_v18  ;;  %3680 = vmatpush3.msra.mxu0 %v4215_v5 }
 0x287   :  { %3681 = vmatprep.mubr.msk.f32.mxu0 %vm4118_vm1, %v4117_v8  ;;  %3692 = vmatprep.mubr.msk.f32.mxu1 %vm4118_vm1, %v4117_v8 }
 0x288   :  { %3695 = vmatprep.subr.mxu0 %v4117_v8  ;;  %3706 = vmatprep.subr.mxu1 %v4117_v8 }
 0x335   :  { %v1054_v45 = vpop.f32.mrf.mxu0  ;;  %v1127_v47 = vpop.f32.mrf.mxu1 }
 0x336   :  { %v1058_v48 = vadd.f32 %v1054_v45, %v984_v44  ;;  %v1131_v49 = vadd.f32 %v1127_v47, %v1060_v46 }
 0x337   :  { %v3639_v50 = vpop.f32.mrf.mxu0  ;;  %v3650_v51 = vpop.f32.mrf.mxu1 }
 0x338   :  { %v3275_v52 = vmul.f32 -1.442695, %v1058_v48  ;;  %v3276_v53 = vmul.f32 -1.442695, %v1131_v49 }
 0x33a   :  { %3972 = vpow2.f32 %v3275_v52 }
 0x33b   :  { %3974 = vpow2.f32 %v3276_v53 }
 0x33e   :  { %v1200_v54 = vpop.f32.mrf.mxu0  ;;  %v1273_v55 = vpop.f32.mrf.mxu1 }
 0x33f   :  { %v1277_v57 = vadd.f32 %v1273_v55, %v1206_v56  ;;  %v1204_v62 = vadd.f32 %v1200_v54, %v1133_v60 }
 0x340   :  { %v3661_v58 = vpop.f32.mrf.mxu0  ;;  %v3672_v59 = vpop.f32.mrf.mxu1 }
 0x341   :  { %v3277_v61 = vmul.f32 -1.442695, %v1277_v57 }
 0x343   :  { %3976 = vpow2.f32 %v3277_v61  ;;  %v4604_v61 = vld [vmem:[%s4867_s4 + $0x18] sm:$0xff] }
 0x344   :  { %3978 = vtanh.f32 %v1204_v62  ;;  %v4613_v62 = vld [vmem:[%s4867_s4 + $0x10] sm:$0xff] }
 0x347   :  { %v3973_v63 = vpop.eup %3972 }
 0x348   :  { %v3975_v2 = vpop.eup %3974  ;;  %v1281_v3 = vadd.f32 1.0, %v3973_v63  ;;  %v4622_v63 = vld [vmem:[%s4867_s4 + $0x8] sm:$0xff] }
 0x349   :  { %v1287_v4 = vadd.f32 1.0, %v3975_v2  ;;  %v4631_v2 = vld [vmem:[%s4867_s4] sm:$0xff] }
 0x34a   :  { %3980 = vrcp.f32 %v1281_v3  ;;  %v1626_v3 = vld [vmem:[#allocation2 + $0x20] sm:$0xff] }
 0x34b   :  { %3982 = vrcp.f32 %v1287_v4 }
 0x350   :  { %v3977_v7 = vpop.eup %3976 }
 0x351   :  { %v3979_v9 = vpop.eup %3978  ;;  %v1294_v13 = vadd.f32 1.0, %v3977_v7  ;;  %v1702_v7 = vld [vmem:[#allocation3 + $0x20] sm:$0xff] }
 0x353   :  { %3984 = vrcp.f32 %v1294_v13 }
 0x357   :  { %v3981_v10 = vpop.eup %3980 }
 0x358   :  { %v3983_v11 = vpop.eup %3982  ;;  %v1298_v12 = vmul.f32 %v3981_v10, %v3979_v9 }
 0x359   :  { %v1297_v14 = vmul.f32 %v3983_v11, %v4474_v40 }
 0x35b   :  { %v4523_v15 = vadd.f32 %v1298_v12, %v1297_v14 }
 0x35d   :  { %3986 = vtanh.f32 %v4523_v15 }
 0x360   :  { %v3985_v28 = vpop.eup %3984 }
 0x36a   :  { %v3987_v29 = vpop.eup %3986 }
 0x36b   :  { %v1301_v30 = vmul.f32 %v3987_v29, %v3985_v28 }
 0x36d   :  { %1303 = vst.msk [vmem:[#allocation6 + $0x10] sm:$0xff] %vm187_vm2, %v1301_v30  ;;  %3682 = vmatmul.mubr.msk.f32.vlgmr.msra.gmra.mxu0 %vm187_vm2, %v1301_v30  ;;  %3693 = vmatmul.mubr.msk.f32.vlgmr.msra.gmra.mxu1 %vm187_vm2, %v1301_v30 }
 0x36e   :  { %3696 = vmatpush3.msra.mxu0 %v4305_v21  ;;  %3707 = vmatpush3.msra.mxu1 %v4302_v20 }
 0x36f   :  { %3697 = vmatprep.subr.mxu0 %v4117_v8  ;;  %3708 = vmatprep.subr.mxu1 %v4117_v8 }
 0x370   :  { %3698 = vmatpush3.msra.mxu0 %v4316_v23  ;;  %3709 = vmatpush3.msra.mxu1 %v4312_v22 }
 0x371   :  { %3699 = vmatprep.subr.mxu0 %v4117_v8  ;;  %3710 = vmatprep.subr.mxu1 %v4117_v8 }
 0x372   :  { %3700 = vmatpush3.msra.mxu0 %v4327_v25  ;;  %3711 = vmatpush3.msra.mxu1 %v4325_v24 }
 0x373   :  { %3701 = vmatprep.subr.mxu0 %v4117_v8  ;;  %3712 = vmatprep.subr.mxu1 %v4117_v8 }
 0x374   :  { %3702 = vmatpush3.msra.mxu0 %v4335_v27  ;;  %3703 = vmatprep.mubr.msk.f32.mxu0 %vm4118_vm1, %v4117_v8 }
 0x375   :  { %3713 = vmatpush3.msra.mxu1 %v4333_v26  ;;  %3714 = vmatprep.mubr.msk.f32.mxu1 %vm4118_vm1, %v4117_v8 }
 0x376   :  { %3704 = vmatmul.mubr.msk.f32.vlgmr.msra.gmra.mxu0 %vm187_vm2, %v1301_v30  ;;  %3715 = vmatmul.mubr.msk.f32.vlgmr.msra.gmra.mxu1 %vm187_vm2, %v1301_v30  ;;  %v1848_v30 = vld [vmem:[#allocation5 + $0x20] sm:$0xff] }
 0x377   :  { %3728 = vmatprep.subr.mxu1 %v4117_v8  ;;  %3717 = vmatprep.subr.mxu0 %v4117_v8 }
 0x378   :  { %3729 = vmatpush3.msra.mxu1 %v4292_v17  ;;  %3718 = vmatpush3.msra.mxu0 %v4196_v1  ;;  %v1305_v1 = vld [vmem:[#allocation2 + $0x18] sm:$0xff] }
 0x379   :  { %3730 = vmatprep.subr.mxu1 %v4117_v8  ;;  %3719 = vmatprep.subr.mxu0 %v4117_v8 }
 0x37a   :  { %3731 = vmatpush3.msra.mxu1 %v4298_v19  ;;  %3720 = vmatpush3.msra.mxu0 %v4220_v6  ;;  %v1381_v6 = vld [vmem:[#allocation3 + $0x18] sm:$0xff] }
 0x37b   :  { %3732 = vmatprep.subr.mxu1 %v4117_v8  ;;  %3721 = vmatprep.subr.mxu0 %v4117_v8 }
 0x37c   :  { %3733 = vmatpush3.msra.mxu1 %v4290_v16  ;;  %3722 = vmatpush3.msra.mxu0 %v4191_v0 }
 0x37d   :  { %3734 = vmatprep.subr.mxu1 %v4117_v8  ;;  %3723 = vmatprep.subr.mxu0 %v4117_v8 }
 0x37e   :  { %3735 = vmatpush3.msra.mxu1 %v4296_v18  ;;  %3724 = vmatpush3.msra.mxu0 %v4215_v5 }
 0x37f   :  { %3725 = vmatprep.mubr.msk.f32.mxu0 %vm4118_vm1, %v4117_v8  ;;  %3736 = vmatprep.mubr.msk.f32.mxu1 %vm4118_vm1, %v4117_v8 }
 0x380   :  { %3739 = vmatprep.subr.mxu0 %v4117_v8  ;;  %3750 = vmatprep.subr.mxu1 %v4117_v8 }
 0x42d   :  { %v1375_v0 = vpop.f32.mrf.mxu0  ;;  %v1448_v31 = vpop.f32.mrf.mxu1 }
 0x42e   :  { %v1379_v32 = vadd.f32 %v1375_v0, %v1305_v1  ;;  %v1452_v33 = vadd.f32 %v1448_v31, %v1381_v6  ;;  %v1775_v31 = vld [vmem:[#allocation4 + $0x20] sm:$0xff] }
 0x42f   :  { %v3683_v34 = vpop.f32.mrf.mxu0  ;;  %v3694_v35 = vpop.f32.mrf.mxu1 }
 0x430   :  { %v3282_v36 = vmul.f32 -1.442695, %v1379_v32  ;;  %v3283_v5 = vmul.f32 -1.442695, %v1452_v33 }
 0x432   :  { %3988 = vpow2.f32 %v3282_v36 }
 0x433   :  { %3990 = vpow2.f32 %v3283_v5 }
 0x436   :  { %v1521_v37 = vpop.f32.mrf.mxu0  ;;  %v1594_v38 = vpop.f32.mrf.mxu1 }
 0x437   :  { %v1598_v40 = vadd.f32 %v1594_v38, %v1527_v39  ;;  %v1525_v45 = vadd.f32 %v1521_v37, %v1454_v43 }
 0x438   :  { %v3705_v41 = vpop.f32.mrf.mxu0  ;;  %v3716_v42 = vpop.f32.mrf.mxu1 }
 0x439   :  { %v3284_v44 = vmul.f32 -1.442695, %v1598_v40 }
 0x43b   :  { %3992 = vpow2.f32 %v3284_v44 }
 0x43c   :  { %3994 = vtanh.f32 %v1525_v45 }
 0x43f   :  { %v3989_v46 = vpop.eup %3988 }
 0x440   :  { %v3991_v47 = vpop.eup %3990  ;;  %v1602_v48 = vadd.f32 1.0, %v3989_v46 }
 0x441   :  { %v1608_v49 = vadd.f32 1.0, %v3991_v47 }
 0x442   :  { %3996 = vrcp.f32 %v1602_v48  ;;  %v1947_v48 = vld [vmem:[#allocation2 + $0x28] sm:$0xff] }
 0x443   :  { %3998 = vrcp.f32 %v1608_v49 }
 0x448   :  { %v3993_v50 = vpop.eup %3992 }
 0x449   :  { %v3995_v51 = vpop.eup %3994  ;;  %v1615_v55 = vadd.f32 1.0, %v3993_v50  ;;  %v2023_v50 = vld [vmem:[#allocation3 + $0x28] sm:$0xff] }
 0x44b   :  { %4000 = vrcp.f32 %v1615_v55 }
 0x44f   :  { %v3997_v52 = vpop.eup %3996 }
 0x450   :  { %v3999_v53 = vpop.eup %3998  ;;  %v1619_v54 = vmul.f32 %v3997_v52, %v3995_v51 }
 0x451   :  { %v1618_v56 = vmul.f32 %v3999_v53, %v4523_v15 }
 0x453   :  { %v4572_v57 = vadd.f32 %v1619_v54, %v1618_v56 }
 0x455   :  { %4002 = vtanh.f32 %v4572_v57 }
 0x458   :  { %v4001_v58 = vpop.eup %4000 }
 0x462   :  { %v4003_v59 = vpop.eup %4002 }
 0x463   :  { %v1622_v60 = vmul.f32 %v4003_v59, %v4001_v58 }
 0x465   :  { %1624 = vst.msk [vmem:[#allocation6 + $0x18] sm:$0xff] %vm187_vm2, %v1622_v60  ;;  %3726 = vmatmul.mubr.msk.f32.vlgmr.msra.gmra.mxu0 %vm187_vm2, %v1622_v60  ;;  %3737 = vmatmul.mubr.msk.f32.vlgmr.msra.gmra.mxu1 %vm187_vm2, %v1622_v60 }
 0x466   :  { %3740 = vmatpush3.msra.mxu0 %v4305_v21  ;;  %3751 = vmatpush3.msra.mxu1 %v4302_v20 }
 0x467   :  { %3741 = vmatprep.subr.mxu0 %v4117_v8  ;;  %3752 = vmatprep.subr.mxu1 %v4117_v8 }
 0x468   :  { %3742 = vmatpush3.msra.mxu0 %v4316_v23  ;;  %3753 = vmatpush3.msra.mxu1 %v4312_v22 }
 0x469   :  { %3743 = vmatprep.subr.mxu0 %v4117_v8  ;;  %3754 = vmatprep.subr.mxu1 %v4117_v8 }
 0x46a   :  { %3744 = vmatpush3.msra.mxu0 %v4327_v25  ;;  %3755 = vmatpush3.msra.mxu1 %v4325_v24 }
 0x46b   :  { %3745 = vmatprep.subr.mxu0 %v4117_v8  ;;  %3756 = vmatprep.subr.mxu1 %v4117_v8 }
 0x46c   :  { %3746 = vmatpush3.msra.mxu0 %v4335_v27  ;;  %3747 = vmatprep.mubr.msk.f32.mxu0 %vm4118_vm1, %v4117_v8 }
 0x46d   :  { %3757 = vmatpush3.msra.mxu1 %v4333_v26  ;;  %3758 = vmatprep.mubr.msk.f32.mxu1 %vm4118_vm1, %v4117_v8 }
 0x46e   :  { %3748 = vmatmul.mubr.msk.f32.vlgmr.msra.gmra.mxu0 %vm187_vm2, %v1622_v60  ;;  %3759 = vmatmul.mubr.msk.f32.vlgmr.msra.gmra.mxu1 %vm187_vm2, %v1622_v60  ;;  %v2169_v60 = vld [vmem:[#allocation5 + $0x28] sm:$0xff] }
 0x46f   :  { %3772 = vmatprep.subr.mxu1 %v4117_v8  ;;  %3761 = vmatprep.subr.mxu0 %v4117_v8 }
 0x470   :  { %3773 = vmatpush3.msra.mxu1 %v4292_v17  ;;  %3762 = vmatpush3.msra.mxu0 %v4604_v61 }
 0x471   :  { %3774 = vmatprep.subr.mxu1 %v4117_v8  ;;  %3763 = vmatprep.subr.mxu0 %v4117_v8 }
 0x472   :  { %3775 = vmatpush3.msra.mxu1 %v4298_v19  ;;  %3764 = vmatpush3.msra.mxu0 %v4613_v62 }
 0x473   :  { %3776 = vmatprep.subr.mxu1 %v4117_v8  ;;  %3765 = vmatprep.subr.mxu0 %v4117_v8 }
 0x474   :  { %3777 = vmatpush3.msra.mxu1 %v4290_v16  ;;  %3766 = vmatpush3.msra.mxu0 %v4622_v63 }
 0x475   :  { %3778 = vmatprep.subr.mxu1 %v4117_v8  ;;  %3767 = vmatprep.subr.mxu0 %v4117_v8 }
 0x476   :  { %3779 = vmatpush3.msra.mxu1 %v4296_v18  ;;  %3768 = vmatpush3.msra.mxu0 %v4631_v2 }
 0x477   :  { %3769 = vmatprep.mubr.msk.f32.mxu0 %vm4118_vm1, %v4117_v8  ;;  %3780 = vmatprep.mubr.msk.f32.mxu1 %vm4118_vm1, %v4117_v8 }
 0x478   :  { %3783 = vmatprep.subr.mxu0 %v4117_v8  ;;  %3794 = vmatprep.subr.mxu1 %v4117_v8 }
 0x525   :  { %v1696_v4 = vpop.f32.mrf.mxu0  ;;  %v1769_v9 = vpop.f32.mrf.mxu1 }
 0x526   :  { %v1700_v10 = vadd.f32 %v1696_v4, %v1626_v3  ;;  %v1773_v11 = vadd.f32 %v1769_v9, %v1702_v7  ;;  %v2096_v9 = vld [vmem:[#allocation4 + $0x28] sm:$0xff] }
 0x527   :  { %v3727_v12 = vpop.f32.mrf.mxu0  ;;  %v3738_v13 = vpop.f32.mrf.mxu1 }
 0x528   :  { %v3289_v14 = vmul.f32 -1.442695, %v1700_v10  ;;  %v3290_v15 = vmul.f32 -1.442695, %v1773_v11 }
 0x52a   :  { %4004 = vpow2.f32 %v3289_v14 }
 0x52b   :  { %4006 = vpow2.f32 %v3290_v15 }
 0x52e   :  { %v1842_v28 = vpop.f32.mrf.mxu0  ;;  %v1915_v29 = vpop.f32.mrf.mxu1 }
 0x52f   :  { %v1919_v1 = vadd.f32 %v1915_v29, %v1848_v30  ;;  %v1846_v33 = vadd.f32 %v1842_v28, %v1775_v31 }
 0x530   :  { %v3749_v0 = vpop.f32.mrf.mxu0  ;;  %v3760_v6 = vpop.f32.mrf.mxu1 }
 0x531   :  { %v3291_v32 = vmul.f32 -1.442695, %v1919_v1 }
 0x533   :  { %4008 = vpow2.f32 %v3291_v32 }
 0x534   :  { %4010 = vtanh.f32 %v1846_v33 }
 0x537   :  { %v4005_v34 = vpop.eup %4004 }
 0x538   :  { %v4007_v35 = vpop.eup %4006  ;;  %v1923_v36 = vadd.f32 1.0, %v4005_v34 }
 0x539   :  { %v1929_v5 = vadd.f32 1.0, %v4007_v35 }
 0x53a   :  { %4012 = vrcp.f32 %v1923_v36 }
 0x53b   :  { %4014 = vrcp.f32 %v1929_v5 }
 0x540   :  { %v4009_v37 = vpop.eup %4008 }
 0x541   :  { %v4011_v38 = vpop.eup %4010  ;;  %v1936_v42 = vadd.f32 1.0, %v4009_v37 }
 0x543   :  { %4016 = vrcp.f32 %v1936_v42 }
 0x547   :  { %v4013_v39 = vpop.eup %4012 }
 0x548   :  { %v4015_v40 = vpop.eup %4014  ;;  %v1940_v41 = vmul.f32 %v4013_v39, %v4011_v38  ;;  %v2490_v39 = vld [vmem:[#allocation5 + $0x30] sm:$0xff] }
 0x549   :  { %v1939_v43 = vmul.f32 %v4015_v40, %v4572_v57 }
 0x54b   :  { %v4641_v44 = vadd.f32 %v1940_v41, %v1939_v43  ;;  %v2417_v43 = vld [vmem:[#allocation4 + $0x30] sm:$0xff] }
 0x54d   :  { %4018 = vtanh.f32 %v4641_v44 }
 0x550   :  { %v4017_v45 = vpop.eup %4016 }
 0x55a   :  { %v4019_v46 = vpop.eup %4018 }
 0x55b   :  { %v1943_v47 = vmul.f32 %v4019_v46, %v4017_v45 }
 0x55d   :  { %1945 = vst.msk [vmem:[#allocation6 + $0x20] sm:$0xff] %vm187_vm2, %v1943_v47  ;;  %3770 = vmatmul.mubr.msk.f32.vlgmr.msra.gmra.mxu0 %vm187_vm2, %v1943_v47  ;;  %3781 = vmatmul.mubr.msk.f32.vlgmr.msra.gmra.mxu1 %vm187_vm2, %v1943_v47 }
 0x55e   :  { %3784 = vmatpush3.msra.mxu0 %v4305_v21  ;;  %3795 = vmatpush3.msra.mxu1 %v4302_v20 }
 0x55f   :  { %3785 = vmatprep.subr.mxu0 %v4117_v8  ;;  %3796 = vmatprep.subr.mxu1 %v4117_v8 }
 0x560   :  { %3786 = vmatpush3.msra.mxu0 %v4316_v23  ;;  %3797 = vmatpush3.msra.mxu1 %v4312_v22 }
 0x561   :  { %3787 = vmatprep.subr.mxu0 %v4117_v8  ;;  %3798 = vmatprep.subr.mxu1 %v4117_v8 }
 0x562   :  { %3788 = vmatpush3.msra.mxu0 %v4327_v25  ;;  %3799 = vmatpush3.msra.mxu1 %v4325_v24 }
 0x563   :  { %3789 = vmatprep.subr.mxu0 %v4117_v8  ;;  %3800 = vmatprep.subr.mxu1 %v4117_v8 }
 0x564   :  { %3790 = vmatpush3.msra.mxu0 %v4335_v27  ;;  %3791 = vmatprep.mubr.msk.f32.mxu0 %vm4118_vm1, %v4117_v8 }
 0x565   :  { %3801 = vmatpush3.msra.mxu1 %v4333_v26  ;;  %3802 = vmatprep.mubr.msk.f32.mxu1 %vm4118_vm1, %v4117_v8 }
 0x566   :  { %3792 = vmatmul.mubr.msk.f32.vlgmr.msra.gmra.mxu0 %vm187_vm2, %v1943_v47  ;;  %3803 = vmatmul.mubr.msk.f32.vlgmr.msra.gmra.mxu1 %vm187_vm2, %v1943_v47 }
 0x567   :  { %3816 = vmatprep.subr.mxu1 %v4117_v8  ;;  %3805 = vmatprep.subr.mxu0 %v4117_v8 }
 0x568   :  { %3817 = vmatpush3.msra.mxu1 %v4292_v17  ;;  %3806 = vmatpush3.msra.mxu0 %v4604_v61 }
 0x569   :  { %3818 = vmatprep.subr.mxu1 %v4117_v8  ;;  %3807 = vmatprep.subr.mxu0 %v4117_v8 }
 0x56a   :  { %3819 = vmatpush3.msra.mxu1 %v4298_v19  ;;  %3808 = vmatpush3.msra.mxu0 %v4613_v62 }
 0x56b   :  { %3820 = vmatprep.subr.mxu1 %v4117_v8  ;;  %3809 = vmatprep.subr.mxu0 %v4117_v8 }
 0x56c   :  { %3821 = vmatpush3.msra.mxu1 %v4290_v16  ;;  %3810 = vmatpush3.msra.mxu0 %v4622_v63 }
 0x56d   :  { %3822 = vmatprep.subr.mxu1 %v4117_v8  ;;  %3811 = vmatprep.subr.mxu0 %v4117_v8 }
 0x56e   :  { %3823 = vmatpush3.msra.mxu1 %v4296_v18  ;;  %3812 = vmatpush3.msra.mxu0 %v4631_v2 }
 0x56f   :  { %3813 = vmatprep.mubr.msk.f32.mxu0 %vm4118_vm1, %v4117_v8  ;;  %3824 = vmatprep.mubr.msk.f32.mxu1 %vm4118_vm1, %v4117_v8 }
 0x570   :  { %3827 = vmatprep.subr.mxu0 %v4117_v8  ;;  %3838 = vmatprep.subr.mxu1 %v4117_v8 }
 0x61d   :  { %v2017_v49 = vpop.f32.mrf.mxu0  ;;  %v2090_v51 = vpop.f32.mrf.mxu1 }
 0x61e   :  { %v2021_v52 = vadd.f32 %v2017_v49, %v1947_v48  ;;  %v2094_v53 = vadd.f32 %v2090_v51, %v2023_v50 }
 0x61f   :  { %v3771_v54 = vpop.f32.mrf.mxu0  ;;  %v3782_v55 = vpop.f32.mrf.mxu1 }
 0x620   :  { %v3296_v56 = vmul.f32 -1.442695, %v2021_v52  ;;  %v3297_v57 = vmul.f32 -1.442695, %v2094_v53 }
 0x622   :  { %4020 = vpow2.f32 %v3296_v56 }
 0x623   :  { %4022 = vpow2.f32 %v3297_v57 }
 0x626   :  { %v2163_v58 = vpop.f32.mrf.mxu0  ;;  %v2236_v59 = vpop.f32.mrf.mxu1 }
 0x627   :  { %v2240_v3 = vadd.f32 %v2236_v59, %v2169_v60  ;;  %v2167_v11 = vadd.f32 %v2163_v58, %v2096_v9  ;;  %v3069_v9 = vld [vmem:[%s4871_s8 + $0x10] sm:$0xff] }
 0x628   :  { %v3793_v4 = vpop.f32.mrf.mxu0  ;;  %v3804_v7 = vpop.f32.mrf.mxu1 }
 0x629   :  { %v3298_v10 = vmul.f32 -1.442695, %v2240_v3  ;;  %v3070_v7 = vld [vmem:[%s4871_s8 + $0x18] sm:$0xff] }
 0x62b   :  { %4024 = vpow2.f32 %v3298_v10  ;;  %v3068_v10 = vld [vmem:[%s4871_s8 + $0x8] sm:$0xff] }
 0x62c   :  { %4026 = vtanh.f32 %v2167_v11  ;;  %v3067_v11 = vld [vmem:[%s4871_s8] sm:$0xff] }
 0x62f   :  { %v4021_v12 = vpop.eup %4020 }
 0x630   :  { %v4023_v13 = vpop.eup %4022  ;;  %v2244_v14 = vadd.f32 1.0, %v4021_v12  ;;  %v2589_v12 = vld [vmem:[#allocation2 + $0x38] sm:$0xff] }
 0x631   :  { %v2250_v15 = vadd.f32 1.0, %v4023_v13 }
 0x632   :  { %4028 = vrcp.f32 %v2244_v14  ;;  %v2665_v14 = vld [vmem:[#allocation3 + $0x38] sm:$0xff] }
 0x633   :  { %4030 = vrcp.f32 %v2250_v15 }
 0x638   :  { %v4025_v28 = vpop.eup %4024 }
 0x639   :  { %v4027_v29 = vpop.eup %4026  ;;  %v2257_v6 = vadd.f32 1.0, %v4025_v28 }
 0x63b   :  { %4032 = vrcp.f32 %v2257_v6 }
 0x63f   :  { %v4029_v30 = vpop.eup %4028 }
 0x640   :  { %v4031_v1 = vpop.eup %4030  ;;  %v2261_v0 = vmul.f32 %v4029_v30, %v4027_v29 }
 0x641   :  { %v2260_v31 = vmul.f32 %v4031_v1, %v4641_v44 }
 0x643   :  { %v4690_v32 = vadd.f32 %v2261_v0, %v2260_v31 }
 0x645   :  { %4034 = vtanh.f32 %v4690_v32 }
 0x648   :  { %v4033_v33 = vpop.eup %4032 }
 0x652   :  { %v4035_v34 = vpop.eup %4034 }
 0x653   :  { %v2264_v35 = vmul.f32 %v4035_v34, %v4033_v33  ;;  %v2811_v33 = vld [vmem:[#allocation5 + $0x38] sm:$0xff] }
 0x655   :  { %2266 = vst.msk [vmem:[#allocation6 + $0x28] sm:$0xff] %vm187_vm2, %v2264_v35  ;;  %3814 = vmatmul.mubr.msk.f32.vlgmr.msra.gmra.mxu0 %vm187_vm2, %v2264_v35  ;;  %3825 = vmatmul.mubr.msk.f32.vlgmr.msra.gmra.mxu1 %vm187_vm2, %v2264_v35 }
 0x656   :  { %3828 = vmatpush3.msra.mxu0 %v4305_v21  ;;  %3839 = vmatpush3.msra.mxu1 %v4302_v20 }
 0x657   :  { %3829 = vmatprep.subr.mxu0 %v4117_v8  ;;  %3840 = vmatprep.subr.mxu1 %v4117_v8 }
 0x658   :  { %3830 = vmatpush3.msra.mxu0 %v4316_v23  ;;  %3841 = vmatpush3.msra.mxu1 %v4312_v22 }
 0x659   :  { %3831 = vmatprep.subr.mxu0 %v4117_v8  ;;  %3842 = vmatprep.subr.mxu1 %v4117_v8 }
 0x65a   :  { %3832 = vmatpush3.msra.mxu0 %v4327_v25  ;;  %3843 = vmatpush3.msra.mxu1 %v4325_v24 }
 0x65b   :  { %3833 = vmatprep.subr.mxu0 %v4117_v8  ;;  %3844 = vmatprep.subr.mxu1 %v4117_v8 }
 0x65c   :  { %3834 = vmatpush3.msra.mxu0 %v4335_v27  ;;  %3835 = vmatprep.mubr.msk.f32.mxu0 %vm4118_vm1, %v4117_v8  ;;  %v2916_v3 = vld [vmem:[#allocation6 + $0x28] sm:$0xff] }
 0x65d   :  { %3845 = vmatpush3.msra.mxu1 %v4333_v26  ;;  %3846 = vmatprep.mubr.msk.f32.mxu1 %vm4118_vm1, %v4117_v8 }
 0x65e   :  { %3836 = vmatmul.mubr.msk.f32.vlgmr.msra.gmra.mxu0 %vm187_vm2, %v2264_v35  ;;  %3847 = vmatmul.mubr.msk.f32.vlgmr.msra.gmra.mxu1 %vm187_vm2, %v2264_v35 }
 0x65f   :  { %3860 = vmatprep.subr.mxu1 %v4117_v8  ;;  %3849 = vmatprep.subr.mxu0 %v4117_v8 }
 0x660   :  { %3861 = vmatpush3.msra.mxu1 %v4292_v17  ;;  %3850 = vmatpush3.msra.mxu0 %v4604_v61 }
 0x661   :  { %3862 = vmatprep.subr.mxu1 %v4117_v8  ;;  %3851 = vmatprep.subr.mxu0 %v4117_v8 }
 0x662   :  { %3863 = vmatpush3.msra.mxu1 %v4298_v19  ;;  %3852 = vmatpush3.msra.mxu0 %v4613_v62  ;;  %v2344_v19 = vld [vmem:[#allocation3 + $0x30] sm:$0xff] }
 0x663   :  { %3864 = vmatprep.subr.mxu1 %v4117_v8  ;;  %3853 = vmatprep.subr.mxu0 %v4117_v8 }
 0x664   :  { %3865 = vmatpush3.msra.mxu1 %v4290_v16  ;;  %3854 = vmatpush3.msra.mxu0 %v4622_v63  ;;  %v2268_v16 = vld [vmem:[#allocation2 + $0x30] sm:$0xff] }
 0x665   :  { %3866 = vmatprep.subr.mxu1 %v4117_v8  ;;  %3855 = vmatprep.subr.mxu0 %v4117_v8 }
 0x666   :  { %3867 = vmatpush3.msra.mxu1 %v4296_v18  ;;  %3856 = vmatpush3.msra.mxu0 %v4631_v2 }
 0x667   :  { %3857 = vmatprep.mubr.msk.f32.mxu0 %vm4118_vm1, %v4117_v8  ;;  %3868 = vmatprep.mubr.msk.f32.mxu1 %vm4118_vm1, %v4117_v8 }
 0x668   :  { %3871 = vmatprep.subr.mxu0 %v4117_v8  ;;  %3882 = vmatprep.subr.mxu1 %v4117_v8 }
 0x715   :  { %v2338_v17 = vpop.f32.mrf.mxu0  ;;  %v2411_v61 = vpop.f32.mrf.mxu1 }
 0x716   :  { %v2342_v62 = vadd.f32 %v2338_v17, %v2268_v16  ;;  %v2415_v63 = vadd.f32 %v2411_v61, %v2344_v19  ;;  %v2738_v17 = vld [vmem:[#allocation4 + $0x38] sm:$0xff] }
 0x717   :  { %v3815_v36 = vpop.f32.mrf.mxu0  ;;  %v3826_v18 = vpop.f32.mrf.mxu1 }
 0x718   :  { %v3303_v5 = vmul.f32 -1.442695, %v2342_v62  ;;  %v3304_v2 = vmul.f32 -1.442695, %v2415_v63  ;;  %v4799_v62 = vld [vmem:[%s4870_s7] ss:$0 sm:$0xff] }
 0x71a   :  { %4036 = vpow2.f32 %v3303_v5 }
 0x71b   :  { %4038 = vpow2.f32 %v3304_v2 }
 0x71e   :  { %v2484_v37 = vpop.f32.mrf.mxu0  ;;  %v2557_v38 = vpop.f32.mrf.mxu1 }
 0x71f   :  { %v2561_v40 = vadd.f32 %v2557_v38, %v2490_v39  ;;  %v2488_v45 = vadd.f32 %v2484_v37, %v2417_v43 }
 0x720   :  { %v3837_v41 = vpop.f32.mrf.mxu0  ;;  %v3848_v42 = vpop.f32.mrf.mxu1 }
 0x721   :  { %v3305_v44 = vmul.f32 -1.442695, %v2561_v40 }
 0x723   :  { %4040 = vpow2.f32 %v3305_v44 }
 0x724   :  { %4042 = vtanh.f32 %v2488_v45 }
 0x727   :  { %v4037_v46 = vpop.eup %4036 }
 0x728   :  { %v4039_v47 = vpop.eup %4038  ;;  %v2565_v48 = vadd.f32 1.0, %v4037_v46 }
 0x729   :  { %v2571_v49 = vadd.f32 1.0, %v4039_v47 }
 0x72a   :  { %4044 = vrcp.f32 %v2565_v48 }
 0x72b   :  { %4046 = vrcp.f32 %v2571_v49 }
 0x730   :  { %v4041_v50 = vpop.eup %4040 }
 0x731   :  { %v4043_v51 = vpop.eup %4042  ;;  %v2578_v55 = vadd.f32 1.0, %v4041_v50 }
 0x733   :  { %4048 = vrcp.f32 %v2578_v55 }
 0x737   :  { %v4045_v52 = vpop.eup %4044 }
 0x738   :  { %v4047_v53 = vpop.eup %4046  ;;  %v2582_v54 = vmul.f32 %v4045_v52, %v4043_v51 }
 0x739   :  { %v2581_v56 = vmul.f32 %v4047_v53, %v4690_v32 }
 0x73b   :  { %v4739_v57 = vadd.f32 %v2582_v54, %v2581_v56 }
 0x73d   :  { %4050 = vtanh.f32 %v4739_v57 }
 0x740   :  { %v4049_v58 = vpop.eup %4048 }
 0x74a   :  { %v4051_v59 = vpop.eup %4050 }
 0x74b   :  { %v2585_v60 = vmul.f32 %v4051_v59, %v4049_v58 }
 0x74d   :  { %2587 = vst.msk [vmem:[#allocation6 + $0x30] sm:$0xff] %vm187_vm2, %v2585_v60  ;;  %3858 = vmatmul.mubr.msk.f32.vlgmr.msra.gmra.mxu0 %vm187_vm2, %v2585_v60  ;;  %3869 = vmatmul.mubr.msk.f32.vlgmr.msra.gmra.mxu1 %vm187_vm2, %v2585_v60 }
 0x74e   :  { %3872 = vmatpush3.msra.mxu0 %v4305_v21  ;;  %3883 = vmatpush3.msra.mxu1 %v4302_v20  ;;  %v2922_v20 = vld [vmem:[%s4869_s6 + $0x18] sm:$0xff]  ;;  %v2911_v21 = vld [vmem:[#allocation6] sm:$0xff] }
 0x74f   :  { %3873 = vmatprep.subr.mxu0 %v4117_v8  ;;  %3884 = vmatprep.subr.mxu1 %v4117_v8 }
 0x750   :  { %3874 = vmatpush3.msra.mxu0 %v4316_v23  ;;  %3885 = vmatpush3.msra.mxu1 %v4312_v22  ;;  %v2921_v22 = vld [vmem:[%s4869_s6 + $0x10] sm:$0xff]  ;;  %v2920_v23 = vld [vmem:[%s4869_s6 + $0x8] sm:$0xff] }
 0x751   :  { %3875 = vmatprep.subr.mxu0 %v4117_v8  ;;  %3886 = vmatprep.subr.mxu1 %v4117_v8 }
 0x752   :  { %3876 = vmatpush3.msra.mxu0 %v4327_v25  ;;  %3887 = vmatpush3.msra.mxu1 %v4325_v24  ;;  %v2912_v24 = vld [vmem:[#allocation6 + $0x8] sm:$0xff]  ;;  %v2913_v25 = vld [vmem:[#allocation6 + $0x10] sm:$0xff] }
 0x753   :  { %3877 = vmatprep.subr.mxu0 %v4117_v8  ;;  %3888 = vmatprep.subr.mxu1 %v4117_v8 }
 0x754   :  { %3878 = vmatpush3.msra.mxu0 %v4335_v27  ;;  %3879 = vmatprep.mubr.msk.f32.mxu0 %vm4118_vm1, %v4117_v8  ;;  %v2915_v27 = vld [vmem:[#allocation6 + $0x20] sm:$0xff]  ;;  %v2917_v4 = vld [vmem:[#allocation6 + $0x30] sm:$0xff] }
 0x755   :  { %3889 = vmatpush3.msra.mxu1 %v4333_v26  ;;  %3890 = vmatprep.mubr.msk.f32.mxu1 %vm4118_vm1, %v4117_v8  ;;  %v2919_v8 = vld [vmem:[%s4869_s6] sm:$0xff]  ;;  %v2914_v26 = vld [vmem:[#allocation6 + $0x18] sm:$0xff]  ;;  %s4072_s6 = scalar_lea.vmem %s3225_s29, 128 }
 0x756   :  { %3880 = vmatmul.mubr.msk.f32.vlgmr.msra.gmra.mxu0 %vm187_vm2, %v2585_v60  ;;  %3891 = vmatmul.mubr.msk.f32.vlgmr.msra.gmra.mxu1 %vm187_vm2, %v2585_v60  ;;  %p4073_p0 = scmp.ne.s32.totalorder %s3225_s29, %s4072_s6  ;;  %p4078_p2 = scmp.lt.s32.totalorder %s4072_s6, %s4072_s6 }
 0x757   :  { %3893 = vmatprep.subr.mxu0 %v2922_v20  ;;  %3901 = vmatprep.mubr.msk.f32.mxu0 %vm187_vm2, %v2911_v21 }
 0x758   :  { %3894 = vmatpush3.msra.mxu0 %v2922_v20  ;;  %3913 = vmatprep.subr.mxu1 %v3070_v7  ;;  %p4079_p3 = por %p4078_p2, %p4077_p1 }
 0x759   :  { %3895 = vmatprep.subr.mxu0 %v2921_v22  ;;  %3914 = vmatpush3.msra.mxu1 %v3070_v7 }
 0x75a   :  { %3896 = vmatpush3.msra.mxu0 %v2921_v22  ;;  %3915 = vmatprep.subr.mxu1 %v3069_v9  ;;  %p4080_p4 = pnand %p4079_p3, %p4073_p0 }
 0x75b   :  { %3897 = vmatprep.subr.mxu0 %v2920_v23  ;;  %3916 = vmatpush3.msra.mxu1 %v3069_v9 }
 0x75c   :  { %3898 = vmatpush3.msra.mxu0 %v2920_v23  ;;  %3917 = vmatprep.subr.mxu1 %v3068_v10 }
 0x75d   :  { %3899 = vmatprep.subr.mxu0 %v2919_v8  ;;  %3918 = vmatpush3.msra.mxu1 %v3068_v10 }
 0x75e   :  { %3900 = vmatpush3.msra.mxu0 %v2919_v8  ;;  %3919 = vmatprep.subr.mxu1 %v3067_v11 }
 0x75f   :  { %3902 = vmatmul.mubr.msk.f32.vlgmr.msra.gmra.mxu0 %vm187_vm2, %v2912_v24  ;;  %3920 = vmatpush3.msra.mxu1 %v3067_v11 }
 0x760   :  { %3904 = vmatprep.mubr.msk.f32.mxu0 %vm187_vm2, %v2913_v25  ;;  %v3322_v25 = vld [vmem:[%s4872_s9] ss:$0 sm:$0xff] }
 0x763   :  { %3905 = vmatmul.mubr.msk.f32.gmra.mxu0 %vm187_vm2, %v2914_v26 }
 0x764   :  { %3907 = vmatprep.mubr.msk.f32.mxu0 %vm187_vm2, %v2915_v27 }
 0x767   :  { %3908 = vmatmul.mubr.msk.f32.gmra.mxu0 %vm187_vm2, %v2916_v3 }
 0x768   :  { %3910 = vmatprep.mubr.msk.f32.mxu0 %vm187_vm2, %v2917_v4 }
 0x80d   :  { %v2659_v13 = vpop.f32.mrf.mxu0  ;;  %v2732_v15 = vpop.f32.mrf.mxu1 }
 0x80e   :  { %v2663_v28 = vadd.f32 %v2659_v13, %v2589_v12  ;;  %v2736_v29 = vadd.f32 %v2732_v15, %v2665_v14 }
 0x80f   :  { %v3859_v30 = vpop.f32.mrf.mxu0  ;;  %v3870_v1 = vpop.f32.mrf.mxu1 }
 0x810   :  { %v3310_v0 = vmul.f32 -1.442695, %v2663_v28  ;;  %v3311_v6 = vmul.f32 -1.442695, %v2736_v29 }
 0x812   :  { %4052 = vpow2.f32 %v3310_v0 }
 0x813   :  { %4054 = vpow2.f32 %v3311_v6 }
 0x816   :  { %v2805_v31 = vpop.f32.mrf.mxu0  ;;  %v2878_v32 = vpop.f32.mrf.mxu1 }
 0x817   :  { %v2882_v34 = vadd.f32 %v2878_v32, %v2811_v33  ;;  %v2809_v61 = vadd.f32 %v2805_v31, %v2738_v17 }
 0x818   :  { %v3881_v35 = vpop.f32.mrf.mxu0  ;;  %v3892_v16 = vpop.f32.mrf.mxu1 }
 0x819   :  { %v3312_v19 = vmul.f32 -1.442695, %v2882_v34 }
 0x81b   :  { %4056 = vpow2.f32 %v3312_v19 }
 0x81c   :  { %4058 = vtanh.f32 %v2809_v61 }
 0x81f   :  { %v4053_v63 = vpop.eup %4052  ;;  %v3903_v36 = vpop.f32.mrf.mxu0 }
 0x820   :  { %v4055_v18 = vpop.eup %4054  ;;  %v2886_v5 = vadd.f32 1.0, %v4053_v63  ;;  %v3026_v37 = vadd.f32 %v3903_v36, %v4799_v62 }
 0x821   :  { %v2892_v2 = vadd.f32 1.0, %v4055_v18  ;;  %v3020_v38 = vpop.f32.mrf.mxu0 }
 0x822   :  { %4060 = vrcp.f32 %v2886_v5  ;;  %v3021_v39 = vadd.f32 %v4799_v62, %v3020_v38  ;;  %v3060_v42 = vmax.f32 %v3026_v37, 0.0 }
 0x823   :  { %4062 = vrcp.f32 %v2892_v2  ;;  %v3906_v40 = vpop.f32.mrf.mxu0 }
 0x824   :  { %v3059_v41 = vmax.f32 %v3021_v39, 0.0  ;;  %v3036_v43 = vadd.f32 %v3906_v40, %v4799_v62 }
 0x825   :  { %v3030_v44 = vpop.f32.mrf.mxu0 }
 0x826   :  { %v3031_v45 = vadd.f32 %v4799_v62, %v3030_v44  ;;  %3921 = vmatprep.mubr.msk.f32.mxu1 %vm187_vm2, %v3059_v41  ;;  %v3062_v48 = vmax.f32 %v3036_v43, 0.0 }
 0x827   :  { %v3909_v46 = vpop.f32.mrf.mxu0  ;;  %3922 = vmatmul.mubr.msk.f32.vlgmr.msra.gmra.mxu1 %vm187_vm2, %v3060_v42 }
 0x828   :  { %v3061_v47 = vmax.f32 %v3031_v45, 0.0  ;;  %v3046_v49 = vadd.f32 %v3909_v46, %v4799_v62  ;;  %v4057_v53 = vpop.eup %4056 }
 0x829   :  { %v3040_v50 = vpop.f32.mrf.mxu0  ;;  %v4059_v55 = vpop.eup %4058  ;;  %v2899_v60 = vadd.f32 1.0, %v4057_v53 }
 0x82a   :  { %v3041_v51 = vadd.f32 %v4799_v62, %v3040_v50  ;;  %3924 = vmatprep.mubr.msk.f32.mxu1 %vm187_vm2, %v3061_v47  ;;  %v3064_v54 = vmax.f32 %v3046_v49, 0.0 }
 0x82b   :  { %3925 = vmatmul.mubr.msk.f32.gmra.mxu1 %vm187_vm2, %v3062_v48  ;;  %4064 = vrcp.f32 %v2899_v60 }
 0x82c   :  { %v3063_v52 = vmax.f32 %v3041_v51, 0.0 }
 0x82e   :  { %3927 = vmatprep.mubr.msk.f32.mxu1 %vm187_vm2, %v3063_v52 }
 0x82f   :  { %v4061_v56 = vpop.eup %4060  ;;  %3928 = vmatmul.mubr.msk.f32.gmra.mxu1 %vm187_vm2, %v3064_v54 }
 0x830   :  { %v4063_v58 = vpop.eup %4062  ;;  %v2903_v59 = vmul.f32 %v4061_v56, %v4059_v55 }
 0x831   :  { %v2902_v20 = vmul.f32 %v4063_v58, %v4739_v57 }
 0x833   :  { %v2904_v21 = vadd.f32 %v2903_v59, %v2902_v20 }
 0x835   :  { %4066 = vtanh.f32 %v2904_v21  ;;  %2910 = vst.msk [vmem:[#allocation9] sm:$0xff] %vm187_vm2, %v2904_v21 }
 0x838   :  { %v4065_v22 = vpop.eup %4064 }
 0x842   :  { %v4067_v23 = vpop.eup %4066 }
 0x843   :  { %v2906_v8 = vmul.f32 %v4067_v23, %v4065_v22 }
 0x845   :  { %2908 = vst.msk [vmem:[#allocation6 + $0x38] sm:$0xff] %vm187_vm2, %v2906_v8  ;;  %2909 = vst.msk [vmem:[#allocation7] sm:$0xff] %vm187_vm2, %v2906_v8 }
 0x84c   :  { %v2918_v24 = vld [vmem:[#allocation6 + $0x38] sm:$0xff] }
 0x84d   :  { %3911 = vmatmul.mubr.msk.f32.gmra.mxu0 %vm187_vm2, %v2918_v24 }
 0x8e7   :  { %v3923_v57 = vpop.f32.mrf.mxu1 }
 0x8e8   :  { %v3174_v26 = vadd.f32 %v3923_v57, %v3322_v25 }
 0x8e9   :  { %v3168_v27 = vpop.f32.mrf.mxu1 }
 0x8ea   :  { %3209 = vst.msk [vmem:[%s4873_s10 + $0x8] sm:$0xff] %vm3207_vm3, %v3174_v26  ;;  %v3169_v3 = vadd.f32 %v3322_v25, %v3168_v27 }
 0x8eb   :  { %v3926_v4 = vpop.f32.mrf.mxu1 }
 0x8ec   :  { %3208 = vst.msk [vmem:[%s4873_s10] sm:$0xff] %vm3207_vm3, %v3169_v3  ;;  %v3184_v7 = vadd.f32 %v3926_v4, %v3322_v25 }
 0x8ed   :  { %v3178_v9 = vpop.f32.mrf.mxu1 }
 0x8ee   :  { %3211 = vst.msk [vmem:[%s4873_s10 + $0x18] sm:$0xff] %vm3207_vm3, %v3184_v7  ;;  %v3179_v10 = vadd.f32 %v3322_v25, %v3178_v9 }
 0x8ef   :  { %v3929_v11 = vpop.f32.mrf.mxu1 }
 0x8f0   :  { %3210 = vst.msk [vmem:[%s4873_s10 + $0x10] sm:$0xff] %vm3207_vm3, %v3179_v10  ;;  %v3194_v12 = vadd.f32 %v3929_v11, %v3322_v25 }
 0x8f1   :  { %v3188_v13 = vpop.f32.mrf.mxu1 }
 0x8f2   :  { %3213 = vst.msk [vmem:[%s4873_s10 + $0x28] sm:$0xff] %vm3207_vm3, %v3194_v12  ;;  %v3189_v14 = vadd.f32 %v3322_v25, %v3188_v13 }
 0x8f4   :  { %3212 = vst.msk [vmem:[%s4873_s10 + $0x20] sm:$0xff] %vm3207_vm3, %v3189_v14 }
 0x90d   :  { %v3912_v15 = vpop.f32.mrf.mxu0 }
 0x90e   :  { %v3056_v28 = vadd.f32 %v3912_v15, %v4799_v62 }
 0x90f   :  { %v3050_v29 = vpop.f32.mrf.mxu0 }
 0x910   :  { %v3051_v30 = vadd.f32 %v4799_v62, %v3050_v29  ;;  %v3066_v0 = vmax.f32 %v3056_v28, 0.0 }
 0x912   :  { %v3065_v1 = vmax.f32 %v3051_v30, 0.0 }
 0x914   :  { %3930 = vmatprep.mubr.msk.f32.mxu1 %vm187_vm2, %v3065_v1 }
 0x915   :  { %3931 = vmatmul.mubr.msk.f32.gmra.mxu1 %vm187_vm2, %v3066_v0 }
 0x916   :  { %4083 = shalt.err (!%p4080_p4)
}
 0x917   :  { %3227 = dma.vmem_to_hbm [thread:$0]  %s3225_s29, 128, %s4874_s11, [#allocation8]  }
 0x918   :  { %s4092_s1 = scalar_lea.vmem %s3235_s13, 128  ;;  %p4097_p6 = scmp.lt.s32.totalorder %s3235_s13, %s3235_s13 }
 0x919   :  { %p4093_p5 = scmp.ne.s32.totalorder %s3235_s13, %s4092_s1  ;;  %p4098_p7 = scmp.lt.s32.totalorder %s4092_s1, %s4092_s1 }
 0x91b   :  { %p4099_p8 = por %p4098_p7, %p4097_p6 }
 0x91d   :  { %p4100_p9 = pnand %p4099_p8, %p4093_p5 }
 0x91f   :  { %4103 = shalt.err (!%p4100_p9)
}
 0x920   :  { %3237 = dma.vmem_to_hbm [thread:$0]  %s3235_s13, 128, %s4875_s12, [#allocation10]  }
 0x9d5   :  { %v3932_v6 = vpop.f32.mrf.mxu1 }
 0x9d6   :  { %v3204_v31 = vadd.f32 %v3932_v6, %v3322_v25 }
 0x9d7   :  { %v3198_v32 = vpop.f32.mrf.mxu1 }
 0x9d8   :  { %3215 = vst.msk [vmem:[%s4873_s10 + $0x38] sm:$0xff] %vm3207_vm3, %v3204_v31  ;;  %v3199_v33 = vadd.f32 %v3322_v25, %v3198_v32 }
 0x9da   :  { %3214 = vst.msk [vmem:[%s4873_s10 + $0x30] sm:$0xff] %vm3207_vm3, %v3199_v33 }
 0x9db   :  { %4112 = dma.done.wait [#allocation8], 128  }
 0x9dc   :  { %4113 = vsyncadd [#allocation8], 4294967168 }
 0x9dd   :  { %4114 = dma.done.wait [#allocation10], 128  }
 0x9de   :  { %4115 = vsyncadd [#allocation10], 4294967168 }
 0x9df   :  { %3246 = vsyncpa [#allocation8], 1 }
 0x9e0   :  { %3247 = vsyncpa [#allocation10], 1 }

</bundles_post_ra>
